<compile_context>
chip_gen: v7x
topology: tpu7x:2x2x1
jax: 0.10.0
libtpu: 0.0.40
codegen_flags: <defaults>
</compile_context>

<pallas_src>
import functools

import jax
import jax.numpy as jnp
from jax import lax
from jax.experimental import pallas as pl
from jax.experimental.pallas import tpu as pltpu

EPS = 1e-5  # nn.GroupNorm default eps


def attn_kernel(x_ref, gmat_ref, gamma_ref, beta_ref,
                wq_ref, bq_ref, wk_ref, bk_ref, wv_ref, bv_ref,
                wp_ref, bp_ref, o_ref, *, HW, C, G):
    n_per_group = float(HW * (C // G))
    scale = float(C) ** -0.5

    x2d = x_ref[...].astype(jnp.float32)                       # (HW, C)

    # ---- GroupNorm (f32 statistics, two-pass variance) -------------------
    gmat = gmat_ref[...]                                        # (C, C) group indicator
    s = jnp.sum(x2d, axis=0, keepdims=True)                     # (1, C) per-channel sums
    mean = jnp.dot(s, gmat, preferred_element_type=jnp.float32) / n_per_group
    d = x2d - mean
    sq = jnp.sum(d * d, axis=0, keepdims=True)                  # (1, C)
    var = jnp.dot(sq, gmat, preferred_element_type=jnp.float32) / n_per_group
    # Fold gamma into the normalizer: one (1,C) multiply instead of an (HW,C) one.
    mul = lax.rsqrt(var + EPS) * gamma_ref[...]                 # (1, C)
    h = d * mul + beta_ref[...]

    # ---- q / k / v projections (bf16 MXU inputs, f32 accumulate) ---------
    hb = h.astype(jnp.bfloat16)
    q = jnp.dot(hb, wq_ref[...], preferred_element_type=jnp.float32) + bq_ref[...]
    k = jnp.dot(hb, wk_ref[...], preferred_element_type=jnp.float32) + bk_ref[...]
    v = jnp.dot(hb, wv_ref[...], preferred_element_type=jnp.float32) + bv_ref[...]

    # ---- attention logits: (q * scale) @ k^T (NT matmul, no transpose) ----
    qs = (q * scale).astype(jnp.bfloat16)                       # fold scale into q
    logits = lax.dot_general(
        qs, k.astype(jnp.bfloat16),
        (((1,), (1,)), ((), ())),
        preferred_element_type=jnp.float32)                     # (HW, HW)

    # ---- softmax over keys (f32) ------------------------------------------
    logits = logits - jnp.max(logits, axis=-1, keepdims=True)
    p = jnp.exp(logits)
    p = p * pl.reciprocal(jnp.sum(p, axis=-1, keepdims=True), approx=True)

    # ---- weighted sum of values + output projection -----------------------
    a = jnp.dot(p.astype(jnp.bfloat16), v.astype(jnp.bfloat16),
                preferred_element_type=jnp.float32)             # (HW, C)
    out = jnp.dot(a.astype(jnp.bfloat16), wp_ref[...],
                  preferred_element_type=jnp.float32) + bp_ref[...]

    # ---- residual (f32) ----------------------------------------------------
    o_ref[...] = (x2d + out).astype(o_ref.dtype)


def attn_block(x, params, *, num_groups):
    B, H, W, C = x.shape
    HW = H * W
    G = num_groups
    Cg = C // G

    x2 = x.reshape(B, HW, C)

    # Same-group indicator matrix, built once (not per grid step).
    ci = jnp.arange(C) // Cg
    gmat = (ci[:, None] == ci[None, :]).astype(jnp.float32)

    wdt = jnp.bfloat16  # weights shipped to VMEM in bf16 (f32 accumulation)

    kernel = functools.partial(attn_kernel, HW=HW, C=C, G=G)
    full2d = lambda b: (0, 0)

    cost = pl.CostEstimate(
        flops=B * (8 * HW * C * C + 4 * HW * HW * C),
        transcendentals=B * (HW * HW + HW),
        bytes_accessed=(2 * B * HW * C * 4      # x in + out (f32)
                        + 4 * C * C * 2         # bf16 projection weights
                        + C * C * 4             # group-indicator matrix
                        + 6 * C * 4))           # biases + affine

    out = pl.pallas_call(
        kernel,
        out_shape=jax.ShapeDtypeStruct((B, HW, C), x.dtype),
        grid_spec=pltpu.PrefetchScalarGridSpec(
            num_scalar_prefetch=0,
            grid=(B,),
            in_specs=[
                pl.BlockSpec((None, HW, C), lambda b: (b, 0, 0)),   # x (batch squeezed)
                pl.BlockSpec((C, C), full2d),                       # gmat
                pl.BlockSpec((1, C), full2d),                       # gamma
                pl.BlockSpec((1, C), full2d),                       # beta
                pl.BlockSpec((C, C), full2d),                       # wq
                pl.BlockSpec((1, C), full2d),                       # bq
                pl.BlockSpec((C, C), full2d),                       # wk
                pl.BlockSpec((1, C), full2d),                       # bk
                pl.BlockSpec((C, C), full2d),                       # wv
                pl.BlockSpec((1, C), full2d),                       # bv
                pl.BlockSpec((C, C), full2d),                       # wp (proj_out)
                pl.BlockSpec((1, C), full2d),                       # bp
            ],
            out_specs=pl.BlockSpec((None, HW, C), lambda b: (b, 0, 0)),
        ),
        compiler_params=pltpu.CompilerParams(
            dimension_semantics=("parallel",),      # B loop shards across v7x TCs
            vmem_limit_bytes=32 * 1024 * 1024),
        cost_estimate=cost,
    )(x2, gmat,
      params["gamma"], params["beta"],
      params["wq"].astype(wdt), params["bq"],
      params["wk"].astype(wdt), params["bk"],
      params["wv"].astype(wdt), params["bv"],
      params["wp"].astype(wdt), params["bp"])
    return out.reshape(B, H, W, C)


def reference(x, params, num_groups):
    """Pure-JAX f32 reference of the same forward pass."""
    B, H, W, C = x.shape
    G = num_groups

    xg = x.reshape(B, H, W, G, C // G)
    mean = xg.mean(axis=(1, 2, 4), keepdims=True)
    var = xg.var(axis=(1, 2, 4), keepdims=True)
    h = ((xg - mean) / jnp.sqrt(var + EPS)).reshape(B, H, W, C)
    h = h * params["gamma"].reshape(1, 1, 1, C) + params["beta"].reshape(1, 1, 1, C)

    q = h @ params["wq"] + params["bq"][0]
    k = h @ params["wk"] + params["bk"][0]
    v = h @ params["wv"] + params["bv"][0]

    w = jnp.einsum('bhwc,bHWc->bhwHW', q, k) * (float(C) ** -0.5)
    w = jax.nn.softmax(w.reshape(B, H, W, H * W), axis=-1).reshape(B, H, W, H, W)
    a = jnp.einsum('bhwHW,bHWc->bhwc', w, v)
    a = a @ params["wp"] + params["bp"][0]
    return x + a


if __name__ == "__main__":
    B, H, W, C = 2, 16, 16, 4
    G = 2  # GroupNorm groups used by normalize()

    key = jax.random.PRNGKey(0)
    ks = jax.random.split(key, 9)
    params = {
        # normalize() builds a fresh GroupNorm each forward -> default affine
        "gamma": jnp.ones((1, C), jnp.float32),
        "beta": jnp.zeros((1, C), jnp.float32),
        # NIN q / k / v / proj_out (stored as (C_in, C_out) for right-multiply)
        "wq": 0.1 * jax.random.normal(ks[0], (C, C), jnp.float32),
        "bq": 0.1 * jax.random.normal(ks[1], (1, C), jnp.float32),
        "wk": 0.1 * jax.random.normal(ks[2], (C, C), jnp.float32),
        "bk": 0.1 * jax.random.normal(ks[3], (1, C), jnp.float32),
        "wv": 0.1 * jax.random.normal(ks[4], (C, C), jnp.float32),
        "bv": 0.1 * jax.random.normal(ks[5], (1, C), jnp.float32),
        "wp": 0.1 * jax.random.normal(ks[6], (C, C), jnp.float32),
        "bp": 0.1 * jax.random.normal(ks[7], (1, C), jnp.float32),
    }
    x = jax.random.normal(ks[8], (B, H, W, C), jnp.float32)

    out = jax.block_until_ready(attn_block(x, params, num_groups=G))
    ref = jax.block_until_ready(reference(x, params, G))

    assert out.shape == (B, H, W, C) and out.dtype == jnp.float32
    max_err = float(jnp.max(jnp.abs(out - ref)))
    assert jnp.allclose(out, ref, rtol=2e-2, atol=2e-2), max_err
    print("KERNEL_OK")
</pallas_src>

<mosaic_0001>
module attributes {stable_mosaic.version = 11 : i64} {
  func.func @attn_kernel(%arg0: i32, %arg1: memref<1x256x4xf32, #tpu.memory_space<vmem>>, %arg2: memref<4x4xf32, #tpu.memory_space<vmem>>, %arg3: memref<1x4xf32, #tpu.memory_space<vmem>>, %arg4: memref<1x4xf32, #tpu.memory_space<vmem>>, %arg5: memref<4x4xbf16, #tpu.memory_space<vmem>>, %arg6: memref<1x4xf32, #tpu.memory_space<vmem>>, %arg7: memref<4x4xbf16, #tpu.memory_space<vmem>>, %arg8: memref<1x4xf32, #tpu.memory_space<vmem>>, %arg9: memref<4x4xbf16, #tpu.memory_space<vmem>>, %arg10: memref<1x4xf32, #tpu.memory_space<vmem>>, %arg11: memref<4x4xbf16, #tpu.memory_space<vmem>>, %arg12: memref<1x4xf32, #tpu.memory_space<vmem>>, %arg13: memref<1x256x4xf32, #tpu.memory_space<vmem>>) attributes {dimension_semantics = [#tpu.dimension_semantics<parallel>], iteration_bounds = array<i64: 2>, scalar_prefetch = 0 : i64, scratch_operands = 0 : i64, tpu.core_type = #tpu.core_type<tc>, window_params = [{transform_indices = @transform_0, window_bounds = array<i64: 1, 256, 4>}, {pipeline_mode = #tpu.pipeline_mode<synchronous>, transform_indices = @transform_1, window_bounds = array<i64: 4, 4>}, {pipeline_mode = #tpu.pipeline_mode<synchronous>, transform_indices = @transform_2, window_bounds = array<i64: 1, 4>}, {pipeline_mode = #tpu.pipeline_mode<synchronous>, transform_indices = @transform_3, window_bounds = array<i64: 1, 4>}, {pipeline_mode = #tpu.pipeline_mode<synchronous>, transform_indices = @transform_4, window_bounds = array<i64: 4, 4>}, {pipeline_mode = #tpu.pipeline_mode<synchronous>, transform_indices = @transform_5, window_bounds = array<i64: 1, 4>}, {pipeline_mode = #tpu.pipeline_mode<synchronous>, transform_indices = @transform_6, window_bounds = array<i64: 4, 4>}, {pipeline_mode = #tpu.pipeline_mode<synchronous>, transform_indices = @transform_7, window_bounds = array<i64: 1, 4>}, {pipeline_mode = #tpu.pipeline_mode<synchronous>, transform_indices = @transform_8, window_bounds = array<i64: 4, 4>}, {pipeline_mode = #tpu.pipeline_mode<synchronous>, transform_indices = @transform_9, window_bounds = array<i64: 1, 4>}, {pipeline_mode = #tpu.pipeline_mode<synchronous>, transform_indices = @transform_10, window_bounds = array<i64: 4, 4>}, {pipeline_mode = #tpu.pipeline_mode<synchronous>, transform_indices = @transform_11, window_bounds = array<i64: 1, 4>}, {transform_indices = @transform_12, window_bounds = array<i64: 1, 256, 4>}]} {
    %c0 = arith.constant 0 : index
    %c0_0 = arith.constant 0 : index
    %c0_1 = arith.constant 0 : index
    %0 = vector.load %arg1[%c0, %c0_0, %c0_1] : memref<1x256x4xf32, #tpu.memory_space<vmem>>, vector<1x256x4xf32>
    %1 = vector.shape_cast %0 : vector<1x256x4xf32> to vector<256x4xf32>
    %c0_2 = arith.constant 0 : index
    %c0_3 = arith.constant 0 : index
    %2 = vector.load %arg2[%c0_2, %c0_3] : memref<4x4xf32, #tpu.memory_space<vmem>>, vector<4x4xf32>
    %cst = arith.constant dense<0.000000e+00> : vector<4xf32>
    %3 = vector.multi_reduction <add>, %1, %cst [0] : vector<256x4xf32> to vector<4xf32>
    %4 = vector.shape_cast %3 : vector<4xf32> to vector<1x4xf32>
    %cst_4 = arith.constant dense<0.000000e+00> : vector<1x4xf32>
    %5 = tpu.matmul %4, %2, %cst_4 {dimension_numbers = #tpu.dot_dimension_numbers<[1], [0], [0], [1], [0, 0, 1, 1], [], []>} : vector<1x4xf32>, vector<4x4xf32>, vector<1x4xf32> -> vector<1x4xf32>
    %cst_5 = arith.constant 5.120000e+02 : f32
    %6 = vector.broadcast %cst_5 : f32 to vector<1x4xf32>
    %7 = arith.divf %5, %6 : vector<1x4xf32>
    %8 = vector.broadcast %7 : vector<1x4xf32> to vector<256x4xf32>
    %9 = arith.subf %1, %8 : vector<256x4xf32>
    %10 = arith.mulf %9, %9 : vector<256x4xf32>
    %cst_6 = arith.constant dense<0.000000e+00> : vector<4xf32>
    %11 = vector.multi_reduction <add>, %10, %cst_6 [0] : vector<256x4xf32> to vector<4xf32>
    %12 = vector.shape_cast %11 : vector<4xf32> to vector<1x4xf32>
    %cst_7 = arith.constant dense<0.000000e+00> : vector<1x4xf32>
    %13 = tpu.matmul %12, %2, %cst_7 {dimension_numbers = #tpu.dot_dimension_numbers<[1], [0], [0], [1], [0, 0, 1, 1], [], []>} : vector<1x4xf32>, vector<4x4xf32>, vector<1x4xf32> -> vector<1x4xf32>
    %cst_8 = arith.constant 5.120000e+02 : f32
    %14 = vector.broadcast %cst_8 : f32 to vector<1x4xf32>
    %15 = arith.divf %13, %14 : vector<1x4xf32>
    %cst_9 = arith.constant 9.99999974E-6 : f32
    %16 = vector.broadcast %cst_9 : f32 to vector<1x4xf32>
    %17 = arith.addf %15, %16 : vector<1x4xf32>
    %18 = math.rsqrt %17 : vector<1x4xf32>
    %c0_10 = arith.constant 0 : index
    %c0_11 = arith.constant 0 : index
    %19 = vector.load %arg3[%c0_10, %c0_11] : memref<1x4xf32, #tpu.memory_space<vmem>>, vector<1x4xf32>
    %20 = arith.mulf %18, %19 : vector<1x4xf32>
    %21 = vector.broadcast %20 : vector<1x4xf32> to vector<256x4xf32>
    %22 = arith.mulf %9, %21 : vector<256x4xf32>
    %c0_12 = arith.constant 0 : index
    %c0_13 = arith.constant 0 : index
    %23 = vector.load %arg4[%c0_12, %c0_13] : memref<1x4xf32, #tpu.memory_space<vmem>>, vector<1x4xf32>
    %24 = vector.broadcast %23 : vector<1x4xf32> to vector<256x4xf32>
    %25 = arith.addf %22, %24 : vector<256x4xf32>
    %26 = arith.truncf %25 : vector<256x4xf32> to vector<256x4xbf16>
    %c0_14 = arith.constant 0 : index
    %c0_15 = arith.constant 0 : index
    %27 = vector.load %arg5[%c0_14, %c0_15] : memref<4x4xbf16, #tpu.memory_space<vmem>>, vector<4x4xbf16>
    %cst_16 = arith.constant dense<0.000000e+00> : vector<256x4xf32>
    %28 = tpu.matmul %26, %27, %cst_16 {dimension_numbers = #tpu.dot_dimension_numbers<[1], [0], [0], [1], [0, 0, 1, 1], [], []>} : vector<256x4xbf16>, vector<4x4xbf16>, vector<256x4xf32> -> vector<256x4xf32>
    %c0_17 = arith.constant 0 : index
    %c0_18 = arith.constant 0 : index
    %29 = vector.load %arg6[%c0_17, %c0_18] : memref<1x4xf32, #tpu.memory_space<vmem>>, vector<1x4xf32>
    %30 = vector.broadcast %29 : vector<1x4xf32> to vector<256x4xf32>
    %31 = arith.addf %28, %30 : vector<256x4xf32>
    %c0_19 = arith.constant 0 : index
    %c0_20 = arith.constant 0 : index
    %32 = vector.load %arg7[%c0_19, %c0_20] : memref<4x4xbf16, #tpu.memory_space<vmem>>, vector<4x4xbf16>
    %cst_21 = arith.constant dense<0.000000e+00> : vector<256x4xf32>
    %33 = tpu.matmul %26, %32, %cst_21 {dimension_numbers = #tpu.dot_dimension_numbers<[1], [0], [0], [1], [0, 0, 1, 1], [], []>} : vector<256x4xbf16>, vector<4x4xbf16>, vector<256x4xf32> -> vector<256x4xf32>
    %c0_22 = arith.constant 0 : index
    %c0_23 = arith.constant 0 : index
    %34 = vector.load %arg8[%c0_22, %c0_23] : memref<1x4xf32, #tpu.memory_space<vmem>>, vector<1x4xf32>
    %35 = vector.broadcast %34 : vector<1x4xf32> to vector<256x4xf32>
    %36 = arith.addf %33, %35 : vector<256x4xf32>
    %c0_24 = arith.constant 0 : index
    %c0_25 = arith.constant 0 : index
    %37 = vector.load %arg9[%c0_24, %c0_25] : memref<4x4xbf16, #tpu.memory_space<vmem>>, vector<4x4xbf16>
    %cst_26 = arith.constant dense<0.000000e+00> : vector<256x4xf32>
    %38 = tpu.matmul %26, %37, %cst_26 {dimension_numbers = #tpu.dot_dimension_numbers<[1], [0], [0], [1], [0, 0, 1, 1], [], []>} : vector<256x4xbf16>, vector<4x4xbf16>, vector<256x4xf32> -> vector<256x4xf32>
    %c0_27 = arith.constant 0 : index
    %c0_28 = arith.constant 0 : index
    %39 = vector.load %arg10[%c0_27, %c0_28] : memref<1x4xf32, #tpu.memory_space<vmem>>, vector<1x4xf32>
    %40 = vector.broadcast %39 : vector<1x4xf32> to vector<256x4xf32>
    %41 = arith.addf %38, %40 : vector<256x4xf32>
    %cst_29 = arith.constant 5.000000e-01 : f32
    %42 = vector.broadcast %cst_29 : f32 to vector<256x4xf32>
    %43 = arith.mulf %31, %42 : vector<256x4xf32>
    %44 = arith.truncf %43 : vector<256x4xf32> to vector<256x4xbf16>
    %45 = arith.truncf %36 : vector<256x4xf32> to vector<256x4xbf16>
    %cst_30 = arith.constant dense<0.000000e+00> : vector<256x256xf32>
    %46 = tpu.matmul %44, %45, %cst_30 {dimension_numbers = #tpu.dot_dimension_numbers<[1], [1], [0], [0], [0, 0, 1, 0], [], []>} : vector<256x4xbf16>, vector<256x4xbf16>, vector<256x256xf32> -> vector<256x256xf32>
    %cst_31 = arith.constant dense<0xFF800000> : vector<256xf32>
    %47 = vector.multi_reduction <maximumf>, %46, %cst_31 [1] : vector<256x256xf32> to vector<256xf32>
    %48 = vector.shape_cast %47 : vector<256xf32> to vector<256x1xf32>
    %49 = vector.broadcast %48 : vector<256x1xf32> to vector<256x256xf32>
    %50 = arith.subf %46, %49 : vector<256x256xf32>
    %51 = math.exp %50 : vector<256x256xf32>
    %cst_32 = arith.constant dense<0.000000e+00> : vector<256xf32>
    %52 = vector.multi_reduction <add>, %51, %cst_32 [1] : vector<256x256xf32> to vector<256xf32>
    %53 = vector.shape_cast %52 : vector<256xf32> to vector<256x1xf32>
    %54 = tpu.reciprocal %53 {approx = true} : vector<256x1xf32> -> vector<256x1xf32>
    %55 = vector.broadcast %54 : vector<256x1xf32> to vector<256x256xf32>
    %56 = arith.mulf %51, %55 : vector<256x256xf32>
    %57 = arith.truncf %56 : vector<256x256xf32> to vector<256x256xbf16>
    %58 = arith.truncf %41 : vector<256x4xf32> to vector<256x4xbf16>
    %cst_33 = arith.constant dense<0.000000e+00> : vector<256x4xf32>
    %59 = tpu.matmul %57, %58, %cst_33 {dimension_numbers = #tpu.dot_dimension_numbers<[1], [0], [0], [1], [0, 0, 1, 1], [], []>} : vector<256x256xbf16>, vector<256x4xbf16>, vector<256x4xf32> -> vector<256x4xf32>
    %60 = arith.truncf %59 : vector<256x4xf32> to vector<256x4xbf16>
    %c0_34 = arith.constant 0 : index
    %c0_35 = arith.constant 0 : index
    %61 = vector.load %arg11[%c0_34, %c0_35] : memref<4x4xbf16, #tpu.memory_space<vmem>>, vector<4x4xbf16>
    %cst_36 = arith.constant dense<0.000000e+00> : vector<256x4xf32>
    %62 = tpu.matmul %60, %61, %cst_36 {dimension_numbers = #tpu.dot_dimension_numbers<[1], [0], [0], [1], [0, 0, 1, 1], [], []>} : vector<256x4xbf16>, vector<4x4xbf16>, vector<256x4xf32> -> vector<256x4xf32>
    %c0_37 = arith.constant 0 : index
    %c0_38 = arith.constant 0 : index
    %63 = vector.load %arg12[%c0_37, %c0_38] : memref<1x4xf32, #tpu.memory_space<vmem>>, vector<1x4xf32>
    %64 = vector.broadcast %63 : vector<1x4xf32> to vector<256x4xf32>
    %65 = arith.addf %62, %64 : vector<256x4xf32>
    %66 = arith.addf %1, %65 : vector<256x4xf32>
    %c0_39 = arith.constant 0 : index
    %c0_40 = arith.constant 0 : index
    %c0_41 = arith.constant 0 : index
    %67 = vector.load %arg13[%c0_39, %c0_40, %c0_41] : memref<1x256x4xf32, #tpu.memory_space<vmem>>, vector<1x256x4xf32>
    %68 = vector.shape_cast %67 : vector<1x256x4xf32> to vector<256x4xf32>
    %69 = vector.shape_cast %66 : vector<256x4xf32> to vector<1x256x4xf32>
    tpu.vector_store %arg13[%c0_39, %c0_40, %c0_41], %69 {strides = array<i32>} : memref<1x256x4xf32, #tpu.memory_space<vmem>>, vector<1x256x4xf32>,
    return
  }
  func.func @transform_0(%arg0: i32) -> (i32, i32, i32) {
    %c0_i32 = arith.constant 0 : i32
    %c0_i32_0 = arith.constant 0 : i32
    %c0_i32_1 = arith.constant 0 : i32
    return %arg0, %c0_i32, %c0_i32_0 : i32, i32, i32
  }
  func.func @transform_1(%arg0: i32) -> (i32, i32) {
    %c0_i32 = arith.constant 0 : i32
    %c0_i32_0 = arith.constant 0 : i32
    %c0_i32_1 = arith.constant 0 : i32
    return %c0_i32, %c0_i32_0 : i32, i32
  }
  func.func @transform_2(%arg0: i32) -> (i32, i32) {
    %c0_i32 = arith.constant 0 : i32
    %c0_i32_0 = arith.constant 0 : i32
    %c0_i32_1 = arith.constant 0 : i32
    return %c0_i32, %c0_i32_0 : i32, i32
  }
  func.func @transform_3(%arg0: i32) -> (i32, i32) {
    %c0_i32 = arith.constant 0 : i32
    %c0_i32_0 = arith.constant 0 : i32
    %c0_i32_1 = arith.constant 0 : i32
    return %c0_i32, %c0_i32_0 : i32, i32
  }
  func.func @transform_4(%arg0: i32) -> (i32, i32) {
    %c0_i32 = arith.constant 0 : i32
    %c0_i32_0 = arith.constant 0 : i32
    %c0_i32_1 = arith.constant 0 : i32
    return %c0_i32, %c0_i32_0 : i32, i32
  }
  func.func @transform_5(%arg0: i32) -> (i32, i32) {
    %c0_i32 = arith.constant 0 : i32
    %c0_i32_0 = arith.constant 0 : i32
    %c0_i32_1 = arith.constant 0 : i32
    return %c0_i32, %c0_i32_0 : i32, i32
  }
  func.func @transform_6(%arg0: i32) -> (i32, i32) {
    %c0_i32 = arith.constant 0 : i32
    %c0_i32_0 = arith.constant 0 : i32
    %c0_i32_1 = arith.constant 0 : i32
    return %c0_i32, %c0_i32_0 : i32, i32
  }
  func.func @transform_7(%arg0: i32) -> (i32, i32) {
    %c0_i32 = arith.constant 0 : i32
    %c0_i32_0 = arith.constant 0 : i32
    %c0_i32_1 = arith.constant 0 : i32
    return %c0_i32, %c0_i32_0 : i32, i32
  }
  func.func @transform_8(%arg0: i32) -> (i32, i32) {
    %c0_i32 = arith.constant 0 : i32
    %c0_i32_0 = arith.constant 0 : i32
    %c0_i32_1 = arith.constant 0 : i32
    return %c0_i32, %c0_i32_0 : i32, i32
  }
  func.func @transform_9(%arg0: i32) -> (i32, i32) {
    %c0_i32 = arith.constant 0 : i32
    %c0_i32_0 = arith.constant 0 : i32
    %c0_i32_1 = arith.constant 0 : i32
    return %c0_i32, %c0_i32_0 : i32, i32
  }
  func.func @transform_10(%arg0: i32) -> (i32, i32) {
    %c0_i32 = arith.constant 0 : i32
    %c0_i32_0 = arith.constant 0 : i32
    %c0_i32_1 = arith.constant 0 : i32
    return %c0_i32, %c0_i32_0 : i32, i32
  }
  func.func @transform_11(%arg0: i32) -> (i32, i32) {
    %c0_i32 = arith.constant 0 : i32
    %c0_i32_0 = arith.constant 0 : i32
    %c0_i32_1 = arith.constant 0 : i32
    return %c0_i32, %c0_i32_0 : i32, i32
  }
  func.func @transform_12(%arg0: i32) -> (i32, i32, i32) {
    %c0_i32 = arith.constant 0 : i32
    %c0_i32_0 = arith.constant 0 : i32
    %c0_i32_1 = arith.constant 0 : i32
    return %arg0, %c0_i32, %c0_i32_0 : i32, i32, i32
  }
}

</mosaic_0001>

<bundles_post_ra>
// kernel: tpu_custom_call.1
= control target key start
LH: loop header
LB: loop body
LE: loop exit
PB: predicated region body
PF: predicated region fallthrough
CT: control target
= control target key end

     0   :  { %s3668_s21 = smov 0   ;;  %s5343_s0 = inlined_call_operand.vmem [shape: f32[2,256,4], index: 0, kind: input, shape index: {}]   ;;  %s5344_s1 = inlined_call_operand.vmem [shape: f32[4,4], index: 1, kind: input, shape index: {}]   ;;  %s5345_s2 = inlined_call_operand.vmem [shape: f32[1,4], index: 2, kind: input, shape index: {}]   ;;  %s5346_s3 = inlined_call_operand.vmem [shape: f32[1,4], index: 3, kind: input, shape index: {}]   ;;  %s5347_s4 = inlined_call_operand.vmem [shape: bf16[4,4], index: 4, kind: input, shape index: {}]   ;;  %s5348_s5 = inlined_call_operand.vmem [shape: f32[1,4], index: 5, kind: input, shape index: {}]   ;;  %s5349_s6 = inlined_call_operand.vmem [shape: bf16[4,4], index: 6, kind: input, shape index: {}]   ;;  %s5350_s7 = inlined_call_operand.vmem [shape: f32[1,4], index: 7, kind: input, shape index: {}]   ;;  %s5351_s8 = inlined_call_operand.vmem [shape: bf16[4,4], index: 8, kind: input, shape index: {}]   ;;  %s5352_s9 = inlined_call_operand.vmem [shape: f32[1,4], index: 9, kind: input, shape index: {}]   ;;  %s5353_s10 = inlined_call_operand.vmem [shape: bf16[4,4], index: 10, kind: input, shape index: {}]   ;;  %s5354_s11 = inlined_call_operand.vmem [shape: f32[1,4], index: 11, kind: input, shape index: {}]   ;;  %s5355_s12 = inlined_call_operand.vmem [shape: f32[2,256,4], index: 12, kind: output, shape index: {}]  }
   0x1 LB: > { %s2865_s22 = sadd.s32 4294967295, %s3599_s21   ;;  %p2869_p0 = scmp.ge.s32.totalorder %s3599_s21, 1  ;;  %s3599_s21 = sphi %s3668_s21, %s22_s21  }
   0x2   : > { %p362_p1 = scmp.lt.s32.totalorder %s3599_s21, 3 }
   0x4   : > { %p363_p2 = pnand %p2869_p0, %p362_p1 }
   0x6   : > { %366 = sbr.rel (%p363_p2) target bundleno = 2106 (0x83a), region = 68 }
   0xd   : > { %v447_v0 = vld [vmem:[%s5344_s1] sm:$0xf]  ;;  %vm521_vm0 = vcmask 1043456   ;;  %p404_p3 = scmp.lt.s32.totalorder %s2865_s22, 1  ;;  %v3601_v1 = vmov 0.0   ;;  %vm3602_vm1 = vmmov 0  }
   0xe   : > { %3199 = vmatprep.subr.mxu0 %v3601_v1  ;;  %3201 = vmatprep.mubr.msk.f32.mxu0 %vm3602_vm1, %v3601_v1  ;;  %vm448_vm2 = vcmask 31744   ;;  %vm959_vm3 = vcmask 1041408  }
   0xf   : > { %3200 = vmatpush3.msk.msra.mxu0 %vm521_vm0, %v447_v0  ;;  %s5446_s22 = smov (!%p404_p3, %s2865_s22), 1  ;;  %3204 = vmatprep.subr.mxu1 %v3601_v1 }
  0x10   : > { %3205 = vmatpush3.msk.msra.mxu1 %vm521_vm0, %v447_v0  ;;  %3206 = vmatprep.mubr.msk.f32.mxu1 %vm3602_vm1, %v3601_v1  ;;  %s2965_s25 = sshll.u32 %s5446_s22, 8 }
  0x11   : > { %s3687_s28 = scalar_lea.vmem %s5343_s0, %s2965_s25  ;;  %s5211_s19 = scalar_lea.vmem %s5355_s12, %s2965_s25 }
  0x12   : > { %v3690_v2 = vld [vmem:[%s3687_s28] sm:$0xff]  ;;  %v3693_v3 = vld [vmem:[%s3687_s28 + $0x8] sm:$0xff]  ;;  %v3696_v4 = vld [vmem:[%s3687_s28 + $0x10] sm:$0xff] }
  0x13   : > { %v3699_v5 = vld [vmem:[%s3687_s28 + $0x18] sm:$0xff]  ;;  %v449_v6 = vsel %vm448_vm2, %v3690_v2, 0.0  ;;  %v450_v7 = vsel %vm448_vm2, %v3693_v3, 0.0  ;;  %v452_v8 = vsel %vm448_vm2, %v3696_v4, 0.0  ;;  %v3708_v9 = vld [vmem:[%s3687_s28 + $0x20] sm:$0xff]  ;;  %v3713_v12 = vld [vmem:[%s3687_s28 + $0x28] sm:$0xff] }
  0x14   : > { %v451_v10 = vadd.f32 %v450_v7, %v449_v6  ;;  %v454_v11 = vsel %vm448_vm2, %v3699_v5, 0.0  ;;  %v456_v14 = vsel %vm448_vm2, %v3708_v9, 0.0  ;;  %v3718_v15 = vld [vmem:[%s3687_s28 + $0x30] sm:$0xff]  ;;  %v458_v17 = vsel %vm448_vm2, %v3713_v12, 0.0  ;;  %v3723_v18 = vld [vmem:[%s3687_s28 + $0x38] sm:$0xff]  ;;  %v3728_v21 = vld [vmem:[%s3687_s28 + $0x40] sm:$0xff] }
  0x15   : > { %v460_v20 = vsel %vm448_vm2, %v3718_v15, 0.0  ;;  %v462_v23 = vsel %vm448_vm2, %v3723_v18, 0.0  ;;  %v3733_v24 = vld [vmem:[%s3687_s28 + $0x48] sm:$0xff]  ;;  %v464_v26 = vsel %vm448_vm2, %v3728_v21, 0.0  ;;  %v3738_v27 = vld [vmem:[%s3687_s28 + $0x50] sm:$0xff]  ;;  %v3743_v30 = vld [vmem:[%s3687_s28 + $0x58] sm:$0xff] }
  0x16   : > { %v453_v13 = vadd.f32 %v452_v8, %v451_v10  ;;  %v466_v29 = vsel %vm448_vm2, %v3733_v24, 0.0  ;;  %v468_v32 = vsel %vm448_vm2, %v3738_v27, 0.0  ;;  %v3748_v33 = vld [vmem:[%s3687_s28 + $0x60] sm:$0xff]  ;;  %v470_v35 = vsel %vm448_vm2, %v3743_v30, 0.0  ;;  %v3753_v36 = vld [vmem:[%s3687_s28 + $0x68] sm:$0xff]  ;;  %v3758_v39 = vld [vmem:[%s3687_s28 + $0x70] sm:$0xff] }
  0x17   : > { %v472_v38 = vsel %vm448_vm2, %v3748_v33, 0.0  ;;  %v474_v41 = vsel %vm448_vm2, %v3753_v36, 0.0  ;;  %v3763_v42 = vld [vmem:[%s3687_s28 + $0x78] sm:$0xff]  ;;  %v476_v44 = vsel %vm448_vm2, %v3758_v39, 0.0  ;;  %v3768_v45 = vld [vmem:[%s3687_s28 + $0x80] sm:$0xff]  ;;  %v3773_v48 = vld [vmem:[%s3687_s28 + $0x88] sm:$0xff] }
  0x18   : > { %v455_v16 = vadd.f32 %v454_v11, %v453_v13  ;;  %v478_v47 = vsel %vm448_vm2, %v3763_v42, 0.0  ;;  %v480_v50 = vsel %vm448_vm2, %v3768_v45, 0.0  ;;  %v3778_v51 = vld [vmem:[%s3687_s28 + $0x90] sm:$0xff]  ;;  %v482_v53 = vsel %vm448_vm2, %v3773_v48, 0.0  ;;  %v3783_v54 = vld [vmem:[%s3687_s28 + $0x98] sm:$0xff]  ;;  %v3788_v57 = vld [vmem:[%s3687_s28 + $0xa0] sm:$0xff] }
  0x19   : > { %v484_v56 = vsel %vm448_vm2, %v3778_v51, 0.0  ;;  %v486_v59 = vsel %vm448_vm2, %v3783_v54, 0.0  ;;  %v3793_v60 = vld [vmem:[%s3687_s28 + $0xa8] sm:$0xff]  ;;  %v488_v62 = vsel %vm448_vm2, %v3788_v57, 0.0  ;;  %v3798_v63 = vld [vmem:[%s3687_s28 + $0xb0] sm:$0xff]  ;;  %v3803_v6 = vld [vmem:[%s3687_s28 + $0xb8] sm:$0xff] }
  0x1a   : > { %v457_v19 = vadd.f32 %v456_v14, %v455_v16  ;;  %v490_v1 = vsel %vm448_vm2, %v3793_v60, 0.0  ;;  %v492_v8 = vsel %vm448_vm2, %v3798_v63, 0.0  ;;  %v3808_v10 = vld [vmem:[%s3687_s28 + $0xc0] sm:$0xff]  ;;  %v494_v13 = vsel %vm448_vm2, %v3803_v6, 0.0  ;;  %v3813_v14 = vld [vmem:[%s3687_s28 + $0xc8] sm:$0xff] }
  0x1c   : > { %v459_v22 = vadd.f32 %v458_v17, %v457_v19  ;;  %v496_v17 = vsel %vm448_vm2, %v3808_v10, 0.0  ;;  %v3818_v19 = vld [vmem:[%s3687_s28 + $0xd0] sm:$0xff] }
  0x1e   : > { %v461_v25 = vadd.f32 %v460_v20, %v459_v22  ;;  %v498_v22 = vsel %vm448_vm2, %v3813_v14, 0.0 }
  0x20   : > { %v463_v28 = vadd.f32 %v462_v23, %v461_v25  ;;  %v3823_v23 = vld [vmem:[%s3687_s28 + $0xd8] sm:$0xff] }
  0x22   : > { %v465_v31 = vadd.f32 %v464_v26, %v463_v28  ;;  %v500_v26 = vsel %vm448_vm2, %v3818_v19, 0.0  ;;  %v3828_v28 = vld [vmem:[%s3687_s28 + $0xe0] sm:$0xff] }
  0x24   : > { %v467_v34 = vadd.f32 %v466_v29, %v465_v31  ;;  %v502_v31 = vsel %vm448_vm2, %v3823_v23, 0.0 }
  0x26   : > { %v469_v37 = vadd.f32 %v468_v32, %v467_v34  ;;  %v3833_v32 = vld [vmem:[%s3687_s28 + $0xe8] sm:$0xff] }
  0x28   : > { %v471_v40 = vadd.f32 %v470_v35, %v469_v37  ;;  %v504_v35 = vsel %vm448_vm2, %v3828_v28, 0.0  ;;  %v3838_v37 = vld [vmem:[%s3687_s28 + $0xf0] sm:$0xff] }
  0x2a   : > { %v473_v43 = vadd.f32 %v472_v38, %v471_v40  ;;  %v506_v40 = vsel %vm448_vm2, %v3833_v32, 0.0 }
  0x2c   : > { %v475_v46 = vadd.f32 %v474_v41, %v473_v43  ;;  %v3843_v41 = vld [vmem:[%s3687_s28 + $0xf8] sm:$0xff] }
  0x2e   : > { %v477_v49 = vadd.f32 %v476_v44, %v475_v46  ;;  %v508_v44 = vsel %vm448_vm2, %v3838_v37, 0.0 }
  0x30   : > { %v479_v52 = vadd.f32 %v478_v47, %v477_v49  ;;  %v510_v47 = vsel %vm448_vm2, %v3843_v41, 0.0 }
  0x32   : > { %v481_v55 = vadd.f32 %v480_v50, %v479_v52 }
  0x34   : > { %v483_v58 = vadd.f32 %v482_v53, %v481_v55 }
  0x36   : > { %v485_v61 = vadd.f32 %v484_v56, %v483_v58 }
  0x38   : > { %v487_v0 = vadd.f32 %v486_v59, %v485_v61  ;;  %v597_v61 = vlaneseq }
  0x3a   : > { %v489_v7 = vadd.f32 %v488_v62, %v487_v0  ;;  %v3850_v0 = vshrl.u32 %v597_v61, 7 }
  0x3c   : > { %v491_v11 = vadd.f32 %v490_v1, %v489_v7 }
  0x3e   : > { %v493_v16 = vadd.f32 %v492_v8, %v491_v11  ;;  %v599_v8 = vsub.s32 0, %v3850_v0 }
  0x40   : > { %v495_v20 = vadd.f32 %v494_v13, %v493_v16 }
  0x42   : > { %v497_v25 = vadd.f32 %v496_v17, %v495_v20 }
  0x44   : > { %v499_v29 = vadd.f32 %v498_v22, %v497_v25 }
  0x46   : > { %v501_v34 = vadd.f32 %v500_v26, %v499_v29 }
  0x48   : > { %v503_v38 = vadd.f32 %v502_v31, %v501_v34 }
  0x4a   : > { %v505_v43 = vadd.f32 %v504_v35, %v503_v38 }
  0x4c   : > { %v507_v46 = vadd.f32 %v506_v40, %v505_v43 }
  0x4e   : > { %v509_v49 = vadd.f32 %v508_v44, %v507_v46 }
  0x50   : > { %v511_v50 = vadd.f32 %v510_v47, %v509_v49 }
  0x52   : > { %v512_v52 = vrot.slane %v511_v50, 4 }
  0x54   : > { %v513_v53 = vadd.f32 %v512_v52, %v511_v50 }
  0x56   : > { %v514_v55 = vrot.slane %v513_v53, 2 }
  0x58   : > { %v515_v56 = vadd.f32 %v514_v55, %v513_v53 }
  0x5a   : > { %v516_v58 = vrot.slane %v515_v56, 1 }
  0x5c   : > { %v517_v59 = vadd.f32 %v516_v58, %v515_v56 }
  0x5e   : > { %3202 = vmatmul.mubr.msk.f32.vlgmr.msra.gmra.mrb[0].mxu0 %vm448_vm2, %v517_v59 }
 0x131   : > { %v591_v62 = vpop.f32.mrb[0].mxu0 }
 0x132   : > { %v3203_v1 = vpop.f32.mrb[1].mxu0  ;;  %v596_v7 = vmul.f32 0.001953125, %v591_v62 }
 0x134   : > { %v3855_v11 = vrot.slane %v596_v7, %v599_v8 }
 0x136   : > { %v3859_v13 = vsub.f32 %v3690_v2, %v3855_v11  ;;  %v3863_v16 = vsub.f32 %v3693_v3, %v3855_v11  ;;  %v3867_v17 = vsub.f32 %v3696_v4, %v3855_v11  ;;  %v3871_v20 = vsub.f32 %v3699_v5, %v3855_v11 }
 0x137   : > { %v3879_v2 = vsub.f32 %v3708_v9, %v3855_v11  ;;  %v3885_v4 = vsub.f32 %v3713_v12, %v3855_v11  ;;  %v3893_v34 = vsub.f32 %v3718_v15, %v3855_v11  ;;  %v3900_v12 = vsub.f32 %v3723_v18, %v3855_v11 }
 0x138   : > { %v633_v22 = vmul.f32 %v3859_v13, %v3859_v13  ;;  %v634_v25 = vmul.f32 %v3863_v16, %v3863_v16  ;;  %v635_v3 = vmul.f32 %v3867_v17, %v3867_v17  ;;  %v636_v5 = vmul.f32 %v3871_v20, %v3871_v20 }
 0x139   : > { %v637_v9 = vmul.f32 %v3879_v2, %v3879_v2  ;;  %v638_v40 = vmul.f32 %v3885_v4, %v3885_v4  ;;  %v3907_v15 = vsub.f32 %v3728_v21, %v3855_v11  ;;  %v639_v46 = vmul.f32 %v3893_v34, %v3893_v34 }
 0x13a   : > { %v665_v26 = vsel %vm448_vm2, %v633_v22, 0.0  ;;  %v666_v29 = vsel %vm448_vm2, %v634_v25, 0.0  ;;  %v668_v35 = vsel %vm448_vm2, %v635_v3, 0.0  ;;  %v670_v43 = vsel %vm448_vm2, %v636_v5, 0.0 }
 0x13b   : > { %v667_v31 = vadd.f32 %v666_v29, %v665_v26  ;;  %v672_v47 = vsel %vm448_vm2, %v637_v9, 0.0  ;;  %v3914_v18 = vsub.f32 %v3733_v24, %v3855_v11  ;;  %v640_v50 = vmul.f32 %v3900_v12, %v3900_v12 }
 0x13c   : > { %v674_v52 = vsel %vm448_vm2, %v638_v40, 0.0  ;;  %v3921_v21 = vsub.f32 %v3738_v27, %v3855_v11  ;;  %v641_v55 = vmul.f32 %v3907_v15, %v3907_v15  ;;  %v676_v56 = vsel %vm448_vm2, %v639_v46, 0.0 }
 0x13d   : > { %v669_v38 = vadd.f32 %v668_v35, %v667_v31  ;;  %v3928_v24 = vsub.f32 %v3743_v30, %v3855_v11  ;;  %v642_v59 = vmul.f32 %v3914_v18, %v3914_v18  ;;  %v678_v61 = vsel %vm448_vm2, %v640_v50, 0.0 }
 0x13e   : > { %v3935_v27 = vsub.f32 %v3748_v33, %v3855_v11  ;;  %v643_v1 = vmul.f32 %v3921_v21, %v3921_v21  ;;  %v680_v7 = vsel %vm448_vm2, %v641_v55, 0.0  ;;  %v3942_v30 = vsub.f32 %v3753_v36, %v3855_v11 }
 0x13f   : > { %v671_v44 = vadd.f32 %v670_v43, %v669_v38  ;;  %v644_v25 = vmul.f32 %v3928_v24, %v3928_v24  ;;  %v682_v3 = vsel %vm448_vm2, %v642_v59, 0.0  ;;  %v3949_v33 = vsub.f32 %v3758_v39, %v3855_v11 }
 0x140   : > { %v645_v26 = vmul.f32 %v3935_v27, %v3935_v27  ;;  %v684_v29 = vsel %vm448_vm2, %v643_v1, 0.0  ;;  %v3956_v36 = vsub.f32 %v3763_v42, %v3855_v11  ;;  %v646_v9 = vmul.f32 %v3942_v30, %v3942_v30 }
 0x141   : > { %v673_v49 = vadd.f32 %v672_v47, %v671_v44  ;;  %v686_v35 = vsel %vm448_vm2, %v644_v25, 0.0  ;;  %v3963_v39 = vsub.f32 %v3768_v45, %v3855_v11  ;;  %v647_v40 = vmul.f32 %v3949_v33, %v3949_v33 }
 0x142   : > { %v688_v43 = vsel %vm448_vm2, %v645_v26, 0.0  ;;  %v3970_v42 = vsub.f32 %v3773_v48, %v3855_v11  ;;  %v648_v46 = vmul.f32 %v3956_v36, %v3956_v36  ;;  %v690_v47 = vsel %vm448_vm2, %v646_v9, 0.0 }
 0x143   : > { %v675_v53 = vadd.f32 %v674_v52, %v673_v49  ;;  %v3977_v45 = vsub.f32 %v3778_v51, %v3855_v11  ;;  %v649_v50 = vmul.f32 %v3963_v39, %v3963_v39  ;;  %v692_v52 = vsel %vm448_vm2, %v647_v40, 0.0 }
 0x144   : > { %v3984_v48 = vsub.f32 %v3783_v54, %v3855_v11  ;;  %v650_v55 = vmul.f32 %v3970_v42, %v3970_v42  ;;  %v3991_v51 = vsub.f32 %v3788_v57, %v3855_v11  ;;  %v3998_v54 = vsub.f32 %v3793_v60, %v3855_v11 }
 0x145   : > { %v677_v58 = vadd.f32 %v676_v56, %v675_v53  ;;  %v694_v56 = vsel %vm448_vm2, %v648_v46, 0.0  ;;  %v651_v59 = vmul.f32 %v3977_v45, %v3977_v45  ;;  %v4005_v57 = vsub.f32 %v3798_v63, %v3855_v11 }
 0x146   : > { %v652_v1 = vmul.f32 %v3984_v48, %v3984_v48  ;;  %v653_v25 = vmul.f32 %v3991_v51, %v3991_v51  ;;  %v4012_v60 = vsub.f32 %v3803_v6, %v3855_v11  ;;  %v654_v26 = vmul.f32 %v3998_v54, %v3998_v54 }
 0x147   : > { %v679_v62 = vadd.f32 %v678_v61, %v677_v58  ;;  %v696_v61 = vsel %vm448_vm2, %v649_v50, 0.0  ;;  %v4019_v63 = vsub.f32 %v3808_v10, %v3855_v11  ;;  %v655_v9 = vmul.f32 %v4005_v57, %v4005_v57 }
 0x148   : > { %v4026_v6 = vsub.f32 %v3813_v14, %v3855_v11  ;;  %v656_v40 = vmul.f32 %v4012_v60, %v4012_v60  ;;  %v4033_v10 = vsub.f32 %v3818_v19, %v3855_v11  ;;  %v4040_v14 = vsub.f32 %v3823_v23, %v3855_v11 }
 0x149   : > { %v681_v22 = vadd.f32 %v680_v7, %v679_v62  ;;  %v698_v7 = vsel %vm448_vm2, %v650_v55, 0.0  ;;  %v657_v46 = vmul.f32 %v4019_v63, %v4019_v63  ;;  %v4047_v19 = vsub.f32 %v3828_v28, %v3855_v11 }
 0x14a   : > { %v658_v50 = vmul.f32 %v4026_v6, %v4026_v6  ;;  %v659_v55 = vmul.f32 %v4033_v10, %v4033_v10  ;;  %v4054_v23 = vsub.f32 %v3833_v32, %v3855_v11  ;;  %v4061_v28 = vsub.f32 %v3838_v37, %v3855_v11 }
 0x14b   : > { %v683_v5 = vadd.f32 %v682_v3, %v681_v22  ;;  %v700_v3 = vsel %vm448_vm2, %v651_v59, 0.0  ;;  %v660_v59 = vmul.f32 %v4040_v14, %v4040_v14  ;;  %v4068_v32 = vsub.f32 %v3843_v41, %v3855_v11 }
 0x14c   : > { %v663_v37 = vmul.f32 %v4061_v28, %v4061_v28 }
 0x14d   : > { %v685_v31 = vadd.f32 %v684_v29, %v683_v5  ;;  %v702_v29 = vsel %vm448_vm2, %v652_v1, 0.0  ;;  %v661_v1 = vmul.f32 %v4047_v19, %v4047_v19 }
 0x14e   : > { %v724_v41 = vsel %vm448_vm2, %v663_v37, 0.0 }
 0x14f   : > { %v687_v38 = vadd.f32 %v686_v35, %v685_v31  ;;  %v704_v35 = vsel %vm448_vm2, %v653_v25, 0.0  ;;  %v662_v25 = vmul.f32 %v4054_v23, %v4054_v23 }
 0x151   : > { %v689_v44 = vadd.f32 %v688_v43, %v687_v38  ;;  %v706_v43 = vsel %vm448_vm2, %v654_v26, 0.0  ;;  %v720_v26 = vsel %vm448_vm2, %v661_v1, 0.0 }
 0x153   : > { %v691_v49 = vadd.f32 %v690_v47, %v689_v44  ;;  %v708_v47 = vsel %vm448_vm2, %v655_v9, 0.0  ;;  %v722_v9 = vsel %vm448_vm2, %v662_v25, 0.0 }
 0x155   : > { %v693_v53 = vadd.f32 %v692_v52, %v691_v49  ;;  %v710_v52 = vsel %vm448_vm2, %v656_v40, 0.0 }
 0x157   : > { %v695_v58 = vadd.f32 %v694_v56, %v693_v53  ;;  %v712_v56 = vsel %vm448_vm2, %v657_v46, 0.0 }
 0x159   : > { %v697_v62 = vadd.f32 %v696_v61, %v695_v58  ;;  %v714_v61 = vsel %vm448_vm2, %v658_v50, 0.0 }
 0x15b   : > { %v699_v22 = vadd.f32 %v698_v7, %v697_v62  ;;  %v716_v7 = vsel %vm448_vm2, %v659_v55, 0.0 }
 0x15d   : > { %v701_v5 = vadd.f32 %v700_v3, %v699_v22  ;;  %v718_v3 = vsel %vm448_vm2, %v660_v59, 0.0 }
 0x15f   : > { %v703_v31 = vadd.f32 %v702_v29, %v701_v5 }
 0x161   : > { %v705_v38 = vadd.f32 %v704_v35, %v703_v31  ;;  %v664_v31 = vmul.f32 %v4068_v32, %v4068_v32 }
 0x163   : > { %v707_v44 = vadd.f32 %v706_v43, %v705_v38  ;;  %v726_v38 = vsel %vm448_vm2, %v664_v31, 0.0 }
 0x165   : > { %v709_v49 = vadd.f32 %v708_v47, %v707_v44 }
 0x167   : > { %v711_v53 = vadd.f32 %v710_v52, %v709_v49  ;;  %v903_v52 = vld [vmem:[%s5347_s4] sm:$0x3] }
 0x168   : > { %3345 = vmatprep.subr.msk.bf16.mxu0 %vm959_vm3, %v903_v52  ;;  %v961_v55 = vsel %vm959_vm3, %v903_v52, 0 }
 0x169   : > { %v713_v58 = vadd.f32 %v712_v56, %v711_v53  ;;  %v1124_v53 = vld [vmem:[%s5349_s6] sm:$0x3]  ;;  %3210 = vmatpush3.bf16.msra.mxu0 %v961_v55 }
 0x16a   : > { %3346 = vmatprep.subr.msk.bf16.mxu1 %vm959_vm3, %v1124_v53  ;;  %v1133_v56 = vsel %vm959_vm3, %v1124_v53, 0 }
 0x16b   : > { %v715_v62 = vadd.f32 %v714_v61, %v713_v58  ;;  %v1296_v58 = vld [vmem:[%s5351_s8] sm:$0x3] }
 0x16c   : > { %3347 = vmatprep.subr.msk.bf16.mxu0 %vm959_vm3, %v1296_v58 }
 0x16d   : > { %v717_v22 = vadd.f32 %v716_v7, %v715_v62  ;;  %v810_v7 = vld [vmem:[%s5345_s2] sm:$0x1] }
 0x16f   : > { %v719_v5 = vadd.f32 %v718_v3, %v717_v22 }
 0x171   : > { %v721_v29 = vadd.f32 %v720_v26, %v719_v5  ;;  %v4106_v5 = vld [vmem:[%s5346_s3] ss:$0 sm:$0xff] }
 0x173   : > { %v723_v35 = vadd.f32 %v722_v9, %v721_v29 }
 0x175   : > { %v725_v11 = vadd.f32 %v724_v41, %v723_v35 }
 0x177   : > { %v727_v40 = vadd.f32 %v726_v38, %v725_v11 }
 0x179   : > { %v728_v43 = vrot.slane %v727_v40, 4 }
 0x17b   : > { %v729_v44 = vadd.f32 %v728_v43, %v727_v40 }
 0x17d   : > { %v730_v46 = vrot.slane %v729_v44, 2 }
 0x17f   : > { %v731_v47 = vadd.f32 %v730_v46, %v729_v44  ;;  %v1305_v44 = vsel %vm959_vm3, %v1296_v58, 0 }
 0x181   : > { %v732_v49 = vrot.slane %v731_v47, 1 }
 0x183   : > { %v733_v50 = vadd.f32 %v732_v49, %v731_v47 }
 0x185   : > { %3207 = vmatmul.mubr.msk.f32.vlgmr.msra.gmra.mrb[0].mxu1 %vm448_vm2, %v733_v50 }
 0x186   : > { %3244 = vmatpush3.bf16.msra.mxu1 %v1133_v56 }
 0x258   : > { %v803_v59 = vpop.f32.mrb[0].mxu1 }
 0x259   : > { %v807_v61 = vmul.f32 0.001953125, %v803_v59  ;;  %v3208_v62 = vpop.f32.mrb[1].mxu1 }
 0x25b   : > { %v808_v1 = vadd.f32 1e-05, %v807_v61 }
 0x25d   : > { %3367 = vrsqrt.f32 %v808_v1 }
 0x267   : > { %v3368_v22 = vpop.eup %3367 }
 0x268   : > { %v811_v25 = vmul.f32 %v3368_v22, %v810_v7 }
 0x26a   : > { %v4101_v3 = vrot.slane %v811_v25, %v599_v8 }
 0x26c   : > { %v816_v37 = vmul.f32 %v4101_v3, %v3859_v13  ;;  %v817_v26 = vmul.f32 %v4101_v3, %v3863_v16  ;;  %v818_v29 = vmul.f32 %v4101_v3, %v3867_v17  ;;  %v819_v31 = vmul.f32 %v4101_v3, %v3871_v20 }
 0x26d   : > { %v820_v0 = vmul.f32 %v4101_v3, %v3879_v2  ;;  %v821_v8 = vmul.f32 %v4101_v3, %v3885_v4  ;;  %v822_v2 = vmul.f32 %v4101_v3, %v3893_v34  ;;  %v823_v4 = vmul.f32 %v4101_v3, %v3900_v12 }
 0x26e   : > { %v855_v9 = vadd.f32 %v4106_v5, %v816_v37  ;;  %v856_v35 = vadd.f32 %v4106_v5, %v817_v26  ;;  %v857_v13 = vadd.f32 %v4106_v5, %v818_v29  ;;  %v858_v16 = vadd.f32 %v4106_v5, %v819_v31 }
 0x26f   : > { %v859_v41 = vadd.f32 %v4106_v5, %v820_v0  ;;  %v860_v17 = vadd.f32 %v4106_v5, %v821_v8  ;;  %v824_v40 = vmul.f32 %v4101_v3, %v3907_v15  ;;  %v825_v43 = vmul.f32 %v4101_v3, %v3914_v18 }
 0x270   : > { %v4126_v11 = vpack.c.bf16 %v856_v35, %v855_v9  ;;  %v4128_v20 = vpack.c.bf16 %v858_v16, %v857_v13  ;;  %v861_v34 = vadd.f32 %v4106_v5, %v822_v2  ;;  %v862_v12 = vadd.f32 %v4106_v5, %v823_v4 }
 0x271   : > { %v4138_v38 = vpack.c.bf16 %v860_v17, %v859_v41  ;;  %v863_v15 = vadd.f32 %v4106_v5, %v824_v40  ;;  %v864_v18 = vadd.f32 %v4106_v5, %v825_v43  ;;  %v826_v47 = vmul.f32 %v4101_v3, %v3921_v21 }
 0x272   : > { %3211 = vmatprep.mubr.msk.bf16.mxu0 %vm448_vm2, %v4126_v11  ;;  %3245 = vmatprep.mubr.msk.bf16.mxu1 %vm448_vm2, %v4126_v11  ;;  %v4157_v46 = vpack.c.bf16 %v862_v12, %v861_v34  ;;  %v827_v49 = vmul.f32 %v4101_v3, %v3928_v24  ;;  %v828_v52 = vmul.f32 %v4101_v3, %v3935_v27 }
 0x273   : > { %3212 = vmatmul.mubr.msk.bf16.vlgmr.msra.gmra.mrb[4].mxu0 %vm448_vm2, %v4128_v20  ;;  %3246 = vmatmul.mubr.msk.bf16.vlgmr.msra.gmra.mrb[4].mxu1 %vm448_vm2, %v4128_v20  ;;  %v4163_v50 = vpack.c.bf16 %v864_v18, %v863_v15  ;;  %v829_v53 = vmul.f32 %v4101_v3, %v3942_v30  ;;  %v865_v21 = vadd.f32 %v4106_v5, %v826_v47 }
 0x274   : > { %3215 = vmatprep.mubr.msk.bf16.mxu0 %vm448_vm2, %v4138_v38  ;;  %3249 = vmatprep.mubr.msk.bf16.mxu1 %vm448_vm2, %v4138_v38  ;;  %v866_v24 = vadd.f32 %v4106_v5, %v827_v49  ;;  %v867_v27 = vadd.f32 %v4106_v5, %v828_v52  ;;  %v830_v56 = vmul.f32 %v4101_v3, %v3949_v33 }
 0x275   : > { %3278 = vmatpush3.bf16.msra.mxu0 %v1305_v44  ;;  %v868_v30 = vadd.f32 %v4106_v5, %v829_v53  ;;  %v831_v58 = vmul.f32 %v4101_v3, %v3956_v36  ;;  %v832_v61 = vmul.f32 %v4101_v3, %v3963_v39  ;;  %v833_v62 = vmul.f32 %v4101_v3, %v3970_v42 }
 0x276   : > { %v4181_v55 = vpack.c.bf16 %v866_v24, %v865_v21  ;;  %v869_v33 = vadd.f32 %v4106_v5, %v830_v56  ;;  %v834_v7 = vmul.f32 %v4101_v3, %v3977_v45  ;;  %v835_v22 = vmul.f32 %v4101_v3, %v3984_v48 }
 0x277   : > { %v4187_v59 = vpack.c.bf16 %v868_v30, %v867_v27  ;;  %v870_v36 = vadd.f32 %v4106_v5, %v831_v58  ;;  %v871_v39 = vadd.f32 %v4106_v5, %v832_v61  ;;  %v872_v42 = vadd.f32 %v4106_v5, %v833_v62 }
 0x278   : > { %v836_v37 = vmul.f32 %v4101_v3, %v3991_v51  ;;  %v837_v26 = vmul.f32 %v4101_v3, %v3998_v54  ;;  %v873_v45 = vadd.f32 %v4106_v5, %v834_v7  ;;  %v874_v29 = vadd.f32 %v4106_v5, %v835_v22 }
 0x279   : > { %v894_v1 = vpack.c.bf16 %v870_v36, %v869_v33  ;;  %v895_v25 = vpack.c.bf16 %v872_v42, %v871_v39  ;;  %v838_v54 = vmul.f32 %v4101_v3, %v4005_v57  ;;  %v839_v0 = vmul.f32 %v4101_v3, %v4012_v60 }
 0x27a   : > { %v875_v48 = vadd.f32 %v4106_v5, %v836_v37  ;;  %v876_v31 = vadd.f32 %v4106_v5, %v837_v26  ;;  %v896_v51 = vpack.c.bf16 %v874_v29, %v873_v45  ;;  %v840_v9 = vmul.f32 %v4101_v3, %v4019_v63 }
 0x27b   : > { %3216 = vmatmul.mubr.msk.bf16.gmra.mrb[8].mxu0 %vm448_vm2, %v4157_v46  ;;  %3250 = vmatmul.mubr.msk.bf16.gmra.mrb[8].mxu1 %vm448_vm2, %v4157_v46  ;;  %v841_v35 = vmul.f32 %v4101_v3, %v4026_v6  ;;  %v877_v57 = vadd.f32 %v4106_v5, %v838_v54  ;;  %v878_v13 = vadd.f32 %v4106_v5, %v839_v0 }
 0x27c   : > { %3219 = vmatprep.mubr.msk.bf16.mxu0 %vm448_vm2, %v4163_v50  ;;  %3253 = vmatprep.mubr.msk.bf16.mxu1 %vm448_vm2, %v4163_v50  ;;  %v897_v8 = vpack.c.bf16 %v876_v31, %v875_v48  ;;  %v879_v60 = vadd.f32 %v4106_v5, %v840_v9  ;;  %v842_v6 = vmul.f32 %v4101_v3, %v4033_v10 }
 0x27d   : > { %v880_v16 = vadd.f32 %v4106_v5, %v841_v35  ;;  %v898_v63 = vpack.c.bf16 %v878_v13, %v877_v57  ;;  %v843_v41 = vmul.f32 %v4101_v3, %v4040_v14  ;;  %v844_v2 = vmul.f32 %v4101_v3, %v4047_v19 }
 0x27e   : > { %v845_v4 = vmul.f32 %v4101_v3, %v4054_v23  ;;  %v881_v10 = vadd.f32 %v4106_v5, %v842_v6  ;;  %v846_v23 = vmul.f32 %v4101_v3, %v4061_v28  ;;  %v847_v44 = vmul.f32 %v4101_v3, %v4068_v32  ;;  %v4291_v28 = vld [vmem:[%s5348_s5] ss:$0 sm:$0xff] }
 0x27f   : > { %v899_v17 = vpack.c.bf16 %v880_v16, %v879_v60  ;;  %v882_v40 = vadd.f32 %v4106_v5, %v843_v41  ;;  %v883_v14 = vadd.f32 %v4106_v5, %v844_v2 }
 0x280   : > { %v884_v43 = vadd.f32 %v4106_v5, %v845_v4  ;;  %v885_v12 = vadd.f32 %v4106_v5, %v846_v23  ;;  %v886_v15 = vadd.f32 %v4106_v5, %v847_v44  ;;  %v4296_v5 = vld [vmem:[%s5350_s7] ss:$0 sm:$0xff] }
 0x281   : > { %v900_v19 = vpack.c.bf16 %v882_v40, %v881_v10 }
 0x282   : > { %v901_v34 = vpack.c.bf16 %v884_v43, %v883_v14  ;;  %v902_v18 = vpack.c.bf16 %v886_v15, %v885_v12 }
 0x283   : > { %3220 = vmatmul.mubr.msk.bf16.gmra.mrb[12].mxu0 %vm448_vm2, %v4181_v55  ;;  %3254 = vmatmul.mubr.msk.bf16.gmra.mrb[12].mxu1 %vm448_vm2, %v4181_v55 }
 0x284   : > { %3223 = vmatprep.mubr.msk.bf16.mxu0 %vm448_vm2, %v4187_v59  ;;  %3257 = vmatprep.mubr.msk.bf16.mxu1 %vm448_vm2, %v4187_v59 }
 0x28b   : > { %3224 = vmatmul.mubr.msk.bf16.gmra.mrb[16].mxu0 %vm448_vm2, %v894_v1  ;;  %3258 = vmatmul.mubr.msk.bf16.gmra.mrb[16].mxu1 %vm448_vm2, %v894_v1 }
 0x28c   : > { %3227 = vmatprep.mubr.msk.bf16.mxu0 %vm448_vm2, %v895_v25  ;;  %3261 = vmatprep.mubr.msk.bf16.mxu1 %vm448_vm2, %v895_v25 }
 0x293   : > { %3228 = vmatmul.mubr.msk.bf16.gmra.mrb[20].mxu0 %vm448_vm2, %v896_v51  ;;  %3262 = vmatmul.mubr.msk.bf16.gmra.mrb[20].mxu1 %vm448_vm2, %v896_v51 }
 0x294   : > { %3231 = vmatprep.mubr.msk.bf16.mxu0 %vm448_vm2, %v897_v8  ;;  %3265 = vmatprep.mubr.msk.bf16.mxu1 %vm448_vm2, %v897_v8 }
 0x29b   : > { %3232 = vmatmul.mubr.msk.bf16.gmra.mrb[24].mxu0 %vm448_vm2, %v898_v63  ;;  %3266 = vmatmul.mubr.msk.bf16.gmra.mrb[24].mxu1 %vm448_vm2, %v898_v63 }
 0x29c   : > { %3235 = vmatprep.mubr.msk.bf16.mxu0 %vm448_vm2, %v899_v17  ;;  %3269 = vmatprep.mubr.msk.bf16.mxu1 %vm448_vm2, %v899_v17 }
 0x2a3   : > { %3236 = vmatmul.mubr.msk.bf16.gmra.mrb[28].mxu0 %vm448_vm2, %v900_v19  ;;  %3270 = vmatmul.mubr.msk.bf16.gmra.mrb[28].mxu1 %vm448_vm2, %v900_v19 }
 0x2a4   : > { %3239 = vmatprep.mubr.msk.bf16.mxu0 %vm448_vm2, %v901_v34  ;;  %3273 = vmatprep.mubr.msk.bf16.mxu1 %vm448_vm2, %v901_v34 }
 0x2ab   : > { %3240 = vmatmul.mubr.msk.bf16.gmra.mrb[32].mxu0 %vm448_vm2, %v902_v18  ;;  %3274 = vmatmul.mubr.msk.bf16.gmra.mrb[32].mxu1 %vm448_vm2, %v902_v18 }
 0x2ac   : > { %3279 = vmatprep.mubr.msk.bf16.mxu0 %vm448_vm2, %v4126_v11 }
 0x2b3   : > { %3280 = vmatmul.mubr.msk.bf16.vlgmr.msra.gmra.mrb[36].mxu0 %vm448_vm2, %v4128_v20 }
 0x2b4   : > { %3283 = vmatprep.mubr.msk.bf16.mxu0 %vm448_vm2, %v4138_v38 }
 0x2bb   : > { %3284 = vmatmul.mubr.msk.bf16.gmra.mrb[40].mxu0 %vm448_vm2, %v4157_v46 }
 0x2bc   : > { %3287 = vmatprep.mubr.msk.bf16.mxu0 %vm448_vm2, %v4163_v50 }
 0x2c3   : > { %3288 = vmatmul.mubr.msk.bf16.gmra.mrb[44].mxu0 %vm448_vm2, %v4181_v55 }
 0x2c4   : > { %3291 = vmatprep.mubr.msk.bf16.mxu0 %vm448_vm2, %v4187_v59 }
 0x2cb   : > { %3292 = vmatmul.mubr.msk.bf16.gmra.mrb[48].mxu0 %vm448_vm2, %v894_v1 }
 0x2cc   : > { %3295 = vmatprep.mubr.msk.bf16.mxu0 %vm448_vm2, %v895_v25 }
 0x2d3   : > { %3296 = vmatmul.mubr.msk.bf16.gmra.mrb[52].mxu0 %vm448_vm2, %v896_v51 }
 0x2d4   : > { %3299 = vmatprep.mubr.msk.bf16.mxu0 %vm448_vm2, %v897_v8 }
 0x2db   : > { %3300 = vmatmul.mubr.msk.bf16.gmra.mrb[56].mxu0 %vm448_vm2, %v898_v63 }
 0x2dc   : > { %3303 = vmatprep.mubr.msk.bf16.mxu0 %vm448_vm2, %v899_v17 }
 0x2e3   : > { %3304 = vmatmul.mubr.msk.bf16.gmra.mrb[60].mxu0 %vm448_vm2, %v900_v19 }
 0x2e4   : > { %3307 = vmatprep.mubr.msk.bf16.mxu0 %vm448_vm2, %v901_v34 }
 0x2eb   : > { %3308 = vmatmul.mubr.msk.bf16.gmra.mrb[64].mxu0 %vm448_vm2, %v902_v18 }
 0x346   : > { %v3213_v32 = vpop.f32.mrb[4].mxu0  ;;  %v3247_v3 = vpop.f32.mrb[4].mxu1 }
 0x347   : > { %v1006_v11 = vadd.f32 %v3213_v32, %v4291_v28  ;;  %v997_v20 = vpop.f32.mrb[5].mxu0  ;;  %v1169_v38 = vpop.f32.mrb[5].mxu1  ;;  %v4301_v50 = vadd.f32 %v3247_v3, %v4296_v5 }
 0x348   : > { %v998_v46 = vadd.f32 %v4291_v28, %v997_v20  ;;  %v3214_v47 = vpop.f32.mrb[6].mxu0  ;;  %v3248_v49 = vpop.f32.mrb[6].mxu1  ;;  %v4308_v27 = vadd.f32 %v4296_v5, %v1169_v38 }
 0x349   : > { %v1009_v52 = vadd.f32 %v3214_v47, %v4291_v28  ;;  %v4305_v53 = vadd.f32 %v3248_v49, %v4296_v5  ;;  %v1000_v21 = vpop.f32.mrb[7].mxu0  ;;  %v1172_v24 = vpop.f32.mrb[7].mxu1  ;;  %v1470_v56 = vmul.f32 0.5, %v1006_v11 }
 0x34a   : > { %v1001_v30 = vadd.f32 %v4291_v28, %v1000_v21  ;;  %v4312_v55 = vadd.f32 %v4296_v5, %v1172_v24  ;;  %v1468_v61 = vmul.f32 0.5, %v998_v46 }
 0x34b   : > { %v1471_v58 = vmul.f32 0.5, %v1009_v52  ;;  %v1517_v59 = vpack.c.bf16 %v4305_v53, %v4301_v50 }
 0x34c   : > { %v1469_v62 = vmul.f32 0.5, %v1001_v30  ;;  %v1516_v33 = vpack.c.bf16 %v4312_v55, %v4308_v27 }
 0x34d   : > { %v4318_v36 = vpack.c.bf16 %v1471_v58, %v1470_v56 }
 0x34e   : > { %v4320_v39 = vpack.c.bf16 %v1469_v62, %v1468_v61  ;;  %v3217_v42 = vpop.f32.mrb[8].mxu0  ;;  %v3251_v1 = vpop.f32.mrb[8].mxu1 }
 0x34f   : > { %v1022_v7 = vadd.f32 %v3217_v42, %v4291_v28  ;;  %v1013_v22 = vpop.f32.mrb[9].mxu0  ;;  %v1185_v25 = vpop.f32.mrb[9].mxu1  ;;  %v4327_v29 = vadd.f32 %v3251_v1, %v4296_v5 }
 0x350   : > { %v1014_v37 = vadd.f32 %v4291_v28, %v1013_v22  ;;  %v3218_v26 = vpop.f32.mrb[10].mxu0  ;;  %v3252_v45 = vpop.f32.mrb[10].mxu1  ;;  %3038 = vmatprep.mubr.msk.bf16.mxu1 %vm448_vm2, %v4320_v39  ;;  %v4334_v0 = vadd.f32 %v4296_v5, %v1185_v25 }
 0x351   : > { %v1025_v48 = vadd.f32 %v3218_v26, %v4291_v28  ;;  %v4331_v31 = vadd.f32 %v3252_v45, %v4296_v5  ;;  %v1016_v51 = vpop.f32.mrb[11].mxu0  ;;  %v1188_v54 = vpop.f32.mrb[11].mxu1  ;;  %v1474_v35 = vmul.f32 0.5, %v1022_v7 }
 0x352   : > { %v1017_v8 = vadd.f32 %v4291_v28, %v1016_v51  ;;  %v4338_v9 = vadd.f32 %v4296_v5, %v1188_v54  ;;  %v1472_v60 = vmul.f32 0.5, %v1014_v37 }
 0x353   : > { %v1475_v57 = vmul.f32 0.5, %v1025_v48  ;;  %v1519_v13 = vpack.c.bf16 %v4331_v31, %v4327_v29 }
 0x354   : > { %v1473_v16 = vmul.f32 0.5, %v1017_v8  ;;  %v1518_v63 = vpack.c.bf16 %v4338_v9, %v4334_v0 }
 0x355   : > { %v4344_v6 = vpack.c.bf16 %v1475_v57, %v1474_v35 }
 0x356   : > { %v4346_v41 = vpack.c.bf16 %v1473_v16, %v1472_v60  ;;  %v3221_v17 = vpop.f32.mrb[12].mxu0  ;;  %v3255_v2 = vpop.f32.mrb[12].mxu1 }
 0x357   : > { %v1038_v4 = vadd.f32 %v3221_v17, %v4291_v28  ;;  %v1029_v10 = vpop.f32.mrb[13].mxu0  ;;  %v1201_v40 = vpop.f32.mrb[13].mxu1  ;;  %v4351_v23 = vadd.f32 %v3255_v2, %v4296_v5 }
 0x358   : > { %v1030_v14 = vadd.f32 %v4291_v28, %v1029_v10  ;;  %v3222_v43 = vpop.f32.mrb[14].mxu0  ;;  %v3256_v19 = vpop.f32.mrb[14].mxu1  ;;  %v4358_v18 = vadd.f32 %v4296_v5, %v1201_v40 }
 0x359   : > { %v1041_v44 = vadd.f32 %v3222_v43, %v4291_v28  ;;  %v4355_v34 = vadd.f32 %v3256_v19, %v4296_v5  ;;  %v1032_v12 = vpop.f32.mrb[15].mxu0  ;;  %v1204_v15 = vpop.f32.mrb[15].mxu1  ;;  %v1478_v11 = vmul.f32 0.5, %v1038_v4 }
 0x35a   : > { %v1033_v32 = vadd.f32 %v4291_v28, %v1032_v12  ;;  %v4362_v3 = vadd.f32 %v4296_v5, %v1204_v15  ;;  %v1476_v46 = vmul.f32 0.5, %v1030_v14 }
 0x35b   : > { %v1479_v20 = vmul.f32 0.5, %v1041_v44  ;;  %v1521_v38 = vpack.c.bf16 %v4355_v34, %v4351_v23 }
 0x35c   : > { %v1477_v47 = vmul.f32 0.5, %v1033_v32  ;;  %v1520_v49 = vpack.c.bf16 %v4362_v3, %v4358_v18 }
 0x35d   : > { %v4368_v52 = vpack.c.bf16 %v1479_v20, %v1478_v11 }
 0x35e   : > { %v4370_v21 = vpack.c.bf16 %v1477_v47, %v1476_v46  ;;  %v3225_v24 = vpop.f32.mrb[16].mxu0  ;;  %v3259_v30 = vpop.f32.mrb[16].mxu1 }
 0x35f   : > { %v1054_v56 = vadd.f32 %v3225_v24, %v4291_v28  ;;  %v1045_v58 = vpop.f32.mrb[17].mxu0  ;;  %v1217_v61 = vpop.f32.mrb[17].mxu1  ;;  %v4375_v7 = vadd.f32 %v3259_v30, %v4296_v5 }
 0x360   : > { %v1046_v62 = vadd.f32 %v4291_v28, %v1045_v58  ;;  %v3226_v42 = vpop.f32.mrb[18].mxu0  ;;  %v3260_v1 = vpop.f32.mrb[18].mxu1  ;;  %v4382_v45 = vadd.f32 %v4296_v5, %v1217_v61 }
 0x361   : > { %v1057_v22 = vadd.f32 %v3226_v42, %v4291_v28  ;;  %v4379_v25 = vadd.f32 %v3260_v1, %v4296_v5  ;;  %v1048_v37 = vpop.f32.mrb[19].mxu0  ;;  %v1220_v26 = vpop.f32.mrb[19].mxu1  ;;  %v1482_v54 = vmul.f32 0.5, %v1054_v56 }
 0x362   : > { %v1049_v48 = vadd.f32 %v4291_v28, %v1048_v37  ;;  %v4386_v51 = vadd.f32 %v4296_v5, %v1220_v26  ;;  %v1480_v57 = vmul.f32 0.5, %v1046_v62 }
 0x363   : > { %v1483_v8 = vmul.f32 0.5, %v1057_v22  ;;  %v1523_v35 = vpack.c.bf16 %v4379_v25, %v4375_v7 }
 0x364   : > { %v1481_v60 = vmul.f32 0.5, %v1049_v48  ;;  %v1522_v16 = vpack.c.bf16 %v4386_v51, %v4382_v45 }
 0x365   : > { %v4392_v17 = vpack.c.bf16 %v1483_v8, %v1482_v54  ;;  %v1581_v54 = vsel %vm448_vm2, %v1516_v33, 0 }
 0x366   : > { %v4394_v2 = vpack.c.bf16 %v1481_v60, %v1480_v57  ;;  %v3229_v4 = vpop.f32.mrb[20].mxu0  ;;  %v3263_v10 = vpop.f32.mrb[20].mxu1 }
 0x367   : > { %v1070_v40 = vadd.f32 %v3229_v4, %v4291_v28  ;;  %v1061_v14 = vpop.f32.mrb[21].mxu0  ;;  %v1233_v43 = vpop.f32.mrb[21].mxu1  ;;  %v1242_v15 = vadd.f32 %v3263_v10, %v4296_v5 }
 0x368   : > { %v1062_v19 = vadd.f32 %v4291_v28, %v1061_v14  ;;  %v3230_v44 = vpop.f32.mrb[22].mxu0  ;;  %v3264_v12 = vpop.f32.mrb[22].mxu1  ;;  %v1234_v47 = vadd.f32 %v4296_v5, %v1233_v43 }
 0x369   : > { %v1073_v32 = vadd.f32 %v3230_v44, %v4291_v28  ;;  %v1245_v11 = vadd.f32 %v3264_v12, %v4296_v5  ;;  %v1064_v20 = vpop.f32.mrb[23].mxu0  ;;  %v1236_v46 = vpop.f32.mrb[23].mxu1  ;;  %v1486_v56 = vmul.f32 0.5, %v1070_v40 }
 0x36a   : > { %v1065_v24 = vadd.f32 %v4291_v28, %v1064_v20  ;;  %v1237_v30 = vadd.f32 %v4296_v5, %v1236_v46  ;;  %v1484_v62 = vmul.f32 0.5, %v1062_v19 }
 0x36b   : > { %v1487_v58 = vmul.f32 0.5, %v1073_v32  ;;  %v1525_v61 = vpack.c.bf16 %v1245_v11, %v1242_v15 }
 0x36c   : > { %v1485_v42 = vmul.f32 0.5, %v1065_v24  ;;  %v1524_v1 = vpack.c.bf16 %v1237_v30, %v1234_v47 }
 0x36d   : > { %v4404_v22 = vpack.c.bf16 %v1487_v58, %v1486_v56 }
 0x36e   : > { %v4406_v37 = vpack.c.bf16 %v1485_v42, %v1484_v62  ;;  %v3233_v26 = vpop.f32.mrb[24].mxu0  ;;  %v3267_v48 = vpop.f32.mrb[24].mxu1  ;;  %3348 = vmatprep.subr.msk.bf16.mxu1 %vm448_vm2, %v1524_v1 }
 0x36f   : > { %v1086_v8 = vadd.f32 %v3233_v26, %v4291_v28  ;;  %v1077_v57 = vpop.f32.mrb[25].mxu0  ;;  %v1249_v60 = vpop.f32.mrb[25].mxu1  ;;  %3023 = vmatpush3.bf16.xpose.msra.mxu1 %v1581_v54  ;;  %v1258_v14 = vadd.f32 %v3267_v48, %v4296_v5 }
 0x370   : > { %v1078_v4 = vadd.f32 %v4291_v28, %v1077_v57  ;;  %v3234_v10 = vpop.f32.mrb[26].mxu0  ;;  %v3268_v40 = vpop.f32.mrb[26].mxu1  ;;  %3349 = vmatprep.subr.msk.bf16.mxu1 %vm448_vm2, %v1525_v61  ;;  %v1250_v33 = vadd.f32 %v4296_v5, %v1249_v60  ;;  %v1584_v61 = vsel %vm448_vm2, %v1517_v59, 0 }
 0x371   : > { %v1089_v43 = vadd.f32 %v3234_v10, %v4291_v28  ;;  %v1261_v19 = vadd.f32 %v3268_v40, %v4296_v5  ;;  %v1080_v27 = vpop.f32.mrb[27].mxu0  ;;  %v1252_v55 = vpop.f32.mrb[27].mxu1  ;;  %v1490_v15 = vmul.f32 0.5, %v1086_v8 }
 0x372   : > { %v1081_v44 = vadd.f32 %v4291_v28, %v1080_v27  ;;  %v1253_v12 = vadd.f32 %v4296_v5, %v1252_v55  ;;  %v1488_v20 = vmul.f32 0.5, %v1078_v4 }
 0x373   : > { %v1491_v32 = vmul.f32 0.5, %v1089_v43  ;;  %v1527_v11 = vpack.c.bf16 %v1261_v19, %v1258_v14 }
 0x374   : > { %v1489_v46 = vmul.f32 0.5, %v1081_v44  ;;  %v1526_v47 = vpack.c.bf16 %v1253_v12, %v1250_v33 }
 0x375   : > { %v4422_v24 = vpack.c.bf16 %v1491_v32, %v1490_v15  ;;  %v1587_v32 = vsel %vm448_vm2, %v1518_v63, 0 }
 0x376   : > { %v4424_v30 = vpack.c.bf16 %v1489_v46, %v1488_v20  ;;  %v3237_v56 = vpop.f32.mrb[28].mxu0  ;;  %v3271_v58 = vpop.f32.mrb[28].mxu1 }
 0x377   : > { %v1102_v62 = vadd.f32 %v3237_v56, %v4291_v28  ;;  %v1093_v42 = vpop.f32.mrb[29].mxu0  ;;  %v1265_v1 = vpop.f32.mrb[29].mxu1  ;;  %3025 = vmatpush3.bf16.xpose.msra.mxu1 %v1584_v61  ;;  %v4434_v8 = vadd.f32 %v3271_v58, %v4296_v5 }
 0x378   : > { %v1094_v26 = vadd.f32 %v4291_v28, %v1093_v42  ;;  %v3238_v48 = vpop.f32.mrb[30].mxu0  ;;  %v3272_v54 = vpop.f32.mrb[30].mxu1  ;;  %3350 = vmatprep.subr.msk.bf16.mxu1 %vm448_vm2, %v1526_v47  ;;  %v1266_v60 = vadd.f32 %v4296_v5, %v1265_v1 }
 0x379   : > { %v1105_v57 = vadd.f32 %v3238_v48, %v4291_v28  ;;  %v1277_v50 = vadd.f32 %v3272_v54, %v4296_v5  ;;  %v1096_v53 = vpop.f32.mrb[31].mxu0  ;;  %v1268_v59 = vpop.f32.mrb[31].mxu1  ;;  %v1494_v40 = vmul.f32 0.5, %v1102_v62 }
 0x37a   : > { %v1097_v4 = vadd.f32 %v4291_v28, %v1096_v53  ;;  %v1269_v10 = vadd.f32 %v4296_v5, %v1268_v59  ;;  %v1492_v19 = vmul.f32 0.5, %v1094_v26 }
 0x37b   : > { %v1495_v14 = vmul.f32 0.5, %v1105_v57  ;;  %v1529_v43 = vpack.c.bf16 %v1277_v50, %v4434_v8 }
 0x37c   : > { %v1493_v27 = vmul.f32 0.5, %v1097_v4  ;;  %v1528_v55 = vpack.c.bf16 %v1269_v10, %v1266_v60  ;;  %v4466_v10 = vld [vmem:[%s5352_s9] ss:$0 sm:$0xff] }
 0x37d   : > { %v4442_v33 = vpack.c.bf16 %v1495_v14, %v1494_v40 }
 0x37e   : > { %v4444_v44 = vpack.c.bf16 %v1493_v27, %v1492_v19  ;;  %v3241_v12 = vpop.f32.mrb[32].mxu0  ;;  %v3275_v15 = vpop.f32.mrb[32].mxu1 }
 0x37f   : > { %v1118_v20 = vadd.f32 %v3241_v12, %v4291_v28  ;;  %v1109_v46 = vpop.f32.mrb[33].mxu0  ;;  %v1281_v47 = vpop.f32.mrb[33].mxu1  ;;  %3027 = vmatpush3.bf16.xpose.msra.mxu1 %v1587_v32  ;;  %v1290_v62 = vadd.f32 %v3275_v15, %v4296_v5 }
 0x380   : > { %v1110_v56 = vadd.f32 %v4291_v28, %v1109_v46  ;;  %v3242_v58 = vpop.f32.mrb[34].mxu0  ;;  %v3276_v61 = vpop.f32.mrb[34].mxu1  ;;  %3351 = vmatprep.subr.msk.bf16.mxu1 %vm448_vm2, %v1527_v11  ;;  %v1282_v63 = vadd.f32 %v4296_v5, %v1281_v47 }
 0x381   : > { %v1121_v42 = vadd.f32 %v3242_v58, %v4291_v28  ;;  %v1293_v1 = vadd.f32 %v3276_v61, %v4296_v5  ;;  %v1112_v0 = vpop.f32.mrb[35].mxu0  ;;  %v1284_v9 = vpop.f32.mrb[35].mxu1  ;;  %v1498_v54 = vmul.f32 0.5, %v1118_v20 }
 0x382   : > { %v1113_v26 = vadd.f32 %v4291_v28, %v1112_v0  ;;  %v1285_v48 = vadd.f32 %v4296_v5, %v1284_v9  ;;  %v1496_v50 = vmul.f32 0.5, %v1110_v56  ;;  %v1590_v28 = vsel %vm448_vm2, %v1519_v13, 0 }
 0x383   : > { %v1499_v8 = vmul.f32 0.5, %v1121_v42  ;;  %v1531_v57 = vpack.c.bf16 %v1293_v1, %v1290_v62 }
 0x384   : > { %v1497_v53 = vmul.f32 0.5, %v1113_v26  ;;  %v1530_v11 = vpack.c.bf16 %v1285_v48, %v1282_v63  ;;  %v1599_v48 = vsel %vm448_vm2, %v1522_v16, 0 }
 0x385   : > { %v4459_v59 = vpack.c.bf16 %v1499_v8, %v1498_v54 }
 0x386   : > { %v4461_v60 = vpack.c.bf16 %v1497_v53, %v1496_v50  ;;  %v3281_v4 = vpop.f32.mrb[36].mxu0 }
 0x387   : > { %v1341_v5 = vpop.f32.mrb[37].mxu0  ;;  %3029 = vmatpush3.bf16.xpose.msra.mxu1 %v1590_v28  ;;  %v4474_v14 = vadd.f32 %v3281_v4, %v4466_v10 }
 0x388   : > { %v3282_v40 = vpop.f32.mrb[38].mxu0  ;;  %3352 = vmatprep.subr.msk.bf16.mxu1 %vm448_vm2, %v1528_v55  ;;  %v1342_v12 = vadd.f32 %v4466_v10, %v1341_v5  ;;  %v1593_v55 = vsel %vm448_vm2, %v1520_v49, 0 }
 0x389   : > { %v4477_v19 = vadd.f32 %v3282_v40, %v4466_v10  ;;  %v1344_v27 = vpop.f32.mrb[39].mxu0 }
 0x38a   : > { %v1345_v15 = vadd.f32 %v4466_v10, %v1344_v27 }
 0x38b   : > { %v2334_v29 = vpack.c.bf16 %v4477_v19, %v4474_v14 }
 0x38c   : > { %v2333_v31 = vpack.c.bf16 %v1345_v15, %v1342_v12 }
 0x38e   : > { %v3285_v13 = vpop.f32.mrb[40].mxu0 }
 0x38f   : > { %v1357_v32 = vpop.f32.mrb[41].mxu0  ;;  %3031 = vmatpush3.bf16.xpose.msra.mxu1 %v1593_v55  ;;  %v4489_v46 = vadd.f32 %v3285_v13, %v4466_v10 }
 0x390   : > { %v3286_v20 = vpop.f32.mrb[42].mxu0  ;;  %3353 = vmatprep.subr.msk.bf16.mxu1 %vm448_vm2, %v1529_v43  ;;  %v4495_v58 = vadd.f32 %v4466_v10, %v1357_v32  ;;  %v1596_v43 = vsel %vm448_vm2, %v1521_v38, 0 }
 0x391   : > { %v4492_v47 = vadd.f32 %v3286_v20, %v4466_v10  ;;  %v1360_v56 = vpop.f32.mrb[43].mxu0 }
 0x392   : > { %v1361_v61 = vadd.f32 %v4466_v10, %v1360_v56 }
 0x393   : > { %v2336_v18 = vpack.c.bf16 %v4492_v47, %v4489_v46 }
 0x394   : > { %v2335_v3 = vpack.c.bf16 %v1361_v61, %v4495_v58 }
 0x396   : > { %v3289_v49 = vpop.f32.mrb[44].mxu0 }
 0x397   : > { %v1373_v62 = vpop.f32.mrb[45].mxu0  ;;  %3033 = vmatpush3.bf16.xpose.msra.mxu1 %v1596_v43  ;;  %v4507_v1 = vadd.f32 %v3289_v49, %v4466_v10 }
 0x398   : > { %v3290_v42 = vpop.f32.mrb[46].mxu0  ;;  %3354 = vmatprep.subr.msk.bf16.mxu1 %vm448_vm2, %v1530_v11  ;;  %v4513_v63 = vadd.f32 %v4466_v10, %v1373_v62 }
 0x399   : > { %v4510_v0 = vadd.f32 %v3290_v42, %v4466_v10  ;;  %v1376_v9 = vpop.f32.mrb[47].mxu0 }
 0x39a   : > { %v4516_v26 = vadd.f32 %v4466_v10, %v1376_v9 }
 0x39b   : > { %v2338_v23 = vpack.c.bf16 %v4510_v0, %v4507_v1 }
 0x39c   : > { %v2337_v34 = vpack.c.bf16 %v4516_v26, %v4513_v63 }
 0x39e   : > { %v3293_v38 = vpop.f32.mrb[48].mxu0 }
 0x39f   : > { %v1389_v54 = vpop.f32.mrb[49].mxu0  ;;  %3035 = vmatpush3.bf16.xpose.msra.mxu1 %v1599_v48  ;;  %v4528_v50 = vadd.f32 %v3293_v38, %v4466_v10 }
 0x3a0   : > { %v3294_v8 = vpop.f32.mrb[50].mxu0  ;;  %3355 = vmatprep.subr.msk.bf16.mxu1 %vm448_vm2, %v1531_v57  ;;  %v4534_v4 = vadd.f32 %v4466_v10, %v1389_v54  ;;  %v1602_v57 = vsel %vm448_vm2, %v1523_v35, 0 }
 0x3a1   : > { %v4531_v53 = vadd.f32 %v3294_v8, %v4466_v10  ;;  %v1392_v11 = vpop.f32.mrb[51].mxu0 }
 0x3a2   : > { %v4537_v28 = vadd.f32 %v4466_v10, %v1392_v11 }
 0x3a3   : > { %v2340_v45 = vpack.c.bf16 %v4531_v53, %v4528_v50 }
 0x3a4   : > { %v2339_v51 = vpack.c.bf16 %v4537_v28, %v4534_v4 }
 0x3a6   : > { %v3297_v16 = vpop.f32.mrb[52].mxu0 }
 0x3a7   : > { %v1405_v5 = vpop.f32.mrb[53].mxu0  ;;  %3037 = vmatpush3.bf16.xpose.msra.mxu1 %v1602_v57  ;;  %v1414_v27 = vadd.f32 %v3297_v16, %v4466_v10 }
 0x3a8   : > { %v3298_v40 = vpop.f32.mrb[54].mxu0  ;;  %v1406_v13 = vadd.f32 %v4466_v10, %v1405_v5 }
 0x3a9   : > { %v1417_v12 = vadd.f32 %v3298_v40, %v4466_v10  ;;  %v1408_v15 = vpop.f32.mrb[55].mxu0 }
 0x3aa   : > { %v1409_v55 = vadd.f32 %v4466_v10, %v1408_v15 }
 0x3ab   : > { %v2342_v32 = vpack.c.bf16 %v1417_v12, %v1414_v27 }
 0x3ac   : > { %v2341_v20 = vpack.c.bf16 %v1409_v55, %v1406_v13 }
 0x3ae   : > { %v3301_v56 = vpop.f32.mrb[56].mxu0  ;;  %3039 = vmatmul.mubr.msk.bf16.vlgmr.msra.gmra.mrb[36].mxu1 %vm448_vm2, %v4320_v39  ;;  %3070 = vmatprep.subr.bf16.mxu0 %v2341_v20 }
 0x3af   : > { %v1421_v7 = vpop.f32.mrb[57].mxu0  ;;  %3040 = vmatprep.mubr.msk.bf16.mxu1 %vm448_vm2, %v4318_v36  ;;  %3071 = vmatpush3.bf16.msra.mxu0 %v2333_v31  ;;  %v1430_v35 = vadd.f32 %v3301_v56, %v4466_v10 }
 0x3b0   : > { %v3302_v25 = vpop.f32.mrb[58].mxu0  ;;  %3072 = vmatprep.subr.bf16.mxu0 %v2342_v32  ;;  %v1422_v49 = vadd.f32 %v4466_v10, %v1421_v7 }
 0x3b1   : > { %v1433_v58 = vadd.f32 %v3302_v25, %v4466_v10  ;;  %v1424_v61 = vpop.f32.mrb[59].mxu0 }
 0x3b2   : > { %v1425_v43 = vadd.f32 %v4466_v10, %v1424_v61 }
 0x3b3   : > { %v2344_v62 = vpack.c.bf16 %v1433_v58, %v1430_v35  ;;  %3073 = vmatpush3.bf16.msra.mxu0 %v2334_v29 }
 0x3b4   : > { %v2343_v39 = vpack.c.bf16 %v1425_v43, %v1422_v49 }
 0x3b6   : > { %v3305_v42 = vpop.f32.mrb[60].mxu0  ;;  %3041 = vmatmul.mubr.msk.bf16.gmra.mrb[40].mxu1 %vm448_vm2, %v4318_v36  ;;  %3074 = vmatprep.subr.bf16.mxu0 %v2343_v39 }
 0x3b7   : > { %v1437_v31 = vpop.f32.mrb[61].mxu0  ;;  %3042 = vmatprep.mubr.msk.bf16.mxu1 %vm448_vm2, %v4346_v41  ;;  %3075 = vmatpush3.bf16.msra.mxu0 %v2335_v3  ;;  %v1446_v38 = vadd.f32 %v3305_v42, %v4466_v10 }
 0x3b8   : > { %v3306_v9 = vpop.f32.mrb[62].mxu0  ;;  %3076 = vmatprep.subr.bf16.mxu0 %v2344_v62  ;;  %v1438_v14 = vadd.f32 %v4466_v10, %v1437_v31 }
 0x3b9   : > { %v1449_v48 = vadd.f32 %v3306_v9, %v4466_v10  ;;  %v1440_v54 = vpop.f32.mrb[63].mxu0 }
 0x3ba   : > { %v1441_v19 = vadd.f32 %v4466_v10, %v1440_v54 }
 0x3bb   : > { %v2346_v29 = vpack.c.bf16 %v1449_v48, %v1446_v38  ;;  %3077 = vmatpush3.bf16.msra.mxu0 %v2336_v18 }
 0x3bc   : > { %v2345_v36 = vpack.c.bf16 %v1441_v19, %v1438_v14 }
 0x3be   : > { %v3309_v8 = vpop.f32.mrb[64].mxu0  ;;  %3043 = vmatmul.mubr.msk.bf16.gmra.mrb[44].mxu1 %vm448_vm2, %v4346_v41  ;;  %3078 = vmatprep.subr.bf16.mxu0 %v2345_v36 }
 0x3bf   : > { %v1453_v3 = vpop.f32.mrb[65].mxu0  ;;  %3044 = vmatprep.mubr.msk.bf16.mxu1 %vm448_vm2, %v4344_v6  ;;  %3079 = vmatpush3.bf16.msra.mxu0 %v2337_v34  ;;  %v1462_v16 = vadd.f32 %v3309_v8, %v4466_v10 }
 0x3c0   : > { %v3310_v11 = vpop.f32.mrb[66].mxu0  ;;  %3080 = vmatprep.subr.bf16.mxu0 %v2346_v29  ;;  %v1454_v18 = vadd.f32 %v4466_v10, %v1453_v3 }
 0x3c1   : > { %v1465_v46 = vadd.f32 %v3310_v11, %v4466_v10  ;;  %v1456_v47 = vpop.f32.mrb[67].mxu0 }
 0x3c2   : > { %v1457_v41 = vadd.f32 %v4466_v10, %v1456_v47 }
 0x3c3   : > { %v2348_v57 = vpack.c.bf16 %v1465_v46, %v1462_v16  ;;  %3081 = vmatpush3.bf16.msra.mxu0 %v2338_v23 }
 0x3c4   : > { %v2347_v5 = vpack.c.bf16 %v1457_v41, %v1454_v18 }
 0x3c6   : > { %3045 = vmatmul.mubr.msk.bf16.gmra.mrb[48].mxu1 %vm448_vm2, %v4344_v6  ;;  %3082 = vmatprep.subr.bf16.mxu0 %v2347_v5 }
 0x3c7   : > { %3046 = vmatprep.mubr.msk.bf16.mxu1 %vm448_vm2, %v4370_v21  ;;  %3083 = vmatpush3.bf16.msra.mxu0 %v2339_v51 }
 0x3c8   : > { %3084 = vmatprep.subr.bf16.mxu0 %v2348_v57 }
 0x3cb   : > { %3085 = vmatpush3.bf16.msra.mxu0 %v2340_v45 }
 0x3ce   : > { %3047 = vmatmul.mubr.msk.bf16.gmra.mrb[52].mxu1 %vm448_vm2, %v4370_v21 }
 0x3cf   : > { %3048 = vmatprep.mubr.msk.bf16.mxu1 %vm448_vm2, %v4368_v52 }
 0x3d6   : > { %3049 = vmatmul.mubr.msk.bf16.gmra.mrb[56].mxu1 %vm448_vm2, %v4368_v52 }
 0x3d7   : > { %3050 = vmatprep.mubr.msk.bf16.mxu1 %vm448_vm2, %v4394_v2 }
 0x3de   : > { %3051 = vmatmul.mubr.msk.bf16.gmra.mrb[60].mxu1 %vm448_vm2, %v4394_v2 }
 0x3df   : > { %3052 = vmatprep.mubr.msk.bf16.mxu1 %vm448_vm2, %v4392_v17 }
 0x3e6   : > { %3053 = vmatmul.mubr.msk.bf16.gmra.mrb[64].mxu1 %vm448_vm2, %v4392_v17 }
 0x3e7   : > { %3054 = vmatprep.mubr.msk.bf16.mxu1 %vm448_vm2, %v4406_v37 }
 0x3ee   : > { %3055 = vmatmul.mubr.msk.bf16.gmra.mrb[68].mxu1 %vm448_vm2, %v4406_v37 }
 0x3ef   : > { %3056 = vmatprep.mubr.msk.bf16.mxu1 %vm448_vm2, %v4404_v22 }
 0x3f6   : > { %3057 = vmatmul.mubr.msk.bf16.gmra.mrb[72].mxu1 %vm448_vm2, %v4404_v22 }
 0x3f7   : > { %3058 = vmatprep.mubr.msk.bf16.mxu1 %vm448_vm2, %v4424_v30 }
 0x3fe   : > { %3059 = vmatmul.mubr.msk.bf16.gmra.mrb[76].mxu1 %vm448_vm2, %v4424_v30 }
 0x3ff   : > { %3060 = vmatprep.mubr.msk.bf16.mxu1 %vm448_vm2, %v4422_v24 }
 0x406   : > { %3061 = vmatmul.mubr.msk.bf16.gmra.mrb[80].mxu1 %vm448_vm2, %v4422_v24 }
 0x407   : > { %3062 = vmatprep.mubr.msk.bf16.mxu1 %vm448_vm2, %v4444_v44 }
 0x40e   : > { %3063 = vmatmul.mubr.msk.bf16.gmra.mrb[84].mxu1 %vm448_vm2, %v4444_v44 }
 0x40f   : > { %3064 = vmatprep.mubr.msk.bf16.mxu1 %vm448_vm2, %v4442_v33 }
 0x416   : > { %3065 = vmatmul.mubr.msk.bf16.gmra.mrb[88].mxu1 %vm448_vm2, %v4442_v33 }
 0x417   : > { %3066 = vmatprep.mubr.msk.bf16.mxu1 %vm448_vm2, %v4461_v60 }
 0x41e   : > { %3067 = vmatmul.mubr.msk.bf16.gmra.mrb[92].mxu1 %vm448_vm2, %v4461_v60 }
 0x41f   : > { %3068 = vmatprep.mubr.msk.bf16.mxu1 %vm448_vm2, %v4459_v59 }
 0x426   : > { %3069 = vmatmul.mubr.msk.bf16.gmra.mrb[96].mxu1 %vm448_vm2, %v4459_v59 }
 0x481   : > { %v4643_v6 = vpop.f32.mrb[36].mxu1 }
 0x482   : > { %v4645_v52 = vpop.f32.mrb[37].mxu1 }
 0x483   : > { %v4647_v21 = vpop.f32.mrb[38].mxu1  ;;  %v1821_v17 = vmax.f32 %v4643_v6, %v4645_v52 }
 0x484   : > { %v4651_v2 = vpop.f32.mrb[39].mxu1 }
 0x485   : > { %1822 = vmax.xlane.f32.xlu0 %v1821_v17  ;;  %v1824_v22 = vmax.f32 %v4647_v21, %v4651_v2 }
 0x489   : > { %1825 = vmax.xlane.f32.xlu0 %v1824_v22  ;;  %v4655_v37 = vpop.f32.mrb[40].mxu1 }
 0x48a   : > { %v4657_v24 = vpop.f32.mrb[41].mxu1 }
 0x48b   : > { %v4659_v30 = vpop.f32.mrb[42].mxu1  ;;  %v1827_v33 = vmax.f32 %v4655_v37, %v4657_v24 }
 0x48c   : > { %v4663_v44 = vpop.f32.mrb[43].mxu1 }
 0x48d   : > { %1828 = vmax.xlane.f32.xlu1 %v1827_v33  ;;  %v1830_v59 = vmax.f32 %v4659_v30, %v4663_v44 }
 0x491   : > { %1831 = vmax.xlane.f32.xlu1 %v1830_v59  ;;  %v4667_v60 = vpop.f32.mrb[44].mxu1 }
 0x492   : > { %v4669_v10 = vpop.f32.mrb[45].mxu1 }
 0x493   : > { %v4671_v1 = vpop.f32.mrb[46].mxu1  ;;  %v1833_v0 = vmax.f32 %v4667_v60, %v4669_v10 }
 0x494   : > { %v4675_v63 = vpop.f32.mrb[47].mxu1 }
 0x495   : > { %1834 = vmax.xlane.f32.xlu0 %v1833_v0  ;;  %v1836_v26 = vmax.f32 %v4671_v1, %v4675_v63 }
 0x497   : > { %1837 = vmax.xlane.f32.xlu1 %v1836_v26 }
 0x499   : > { %v4679_v23 = vpop.f32.mrb[48].mxu1 }
 0x49a   : > { %v4681_v34 = vpop.f32.mrb[49].mxu1 }
 0x49b   : > { %v4683_v50 = vpop.f32.mrb[50].mxu1  ;;  %v1839_v53 = vmax.f32 %v4679_v23, %v4681_v34 }
 0x49c   : > { %v4687_v4 = vpop.f32.mrb[51].mxu1 }
 0x49d   : > { %1840 = vmax.xlane.f32.xlu0 %v1839_v53  ;;  %v1842_v28 = vmax.f32 %v4683_v50, %v4687_v4 }
 0x49f   : > { %1843 = vmax.xlane.f32.xlu1 %v1842_v28 }
 0x4a1   : > { %v4691_v45 = vpop.f32.mrb[52].mxu1 }
 0x4a2   : > { %v4693_v51 = vpop.f32.mrb[53].mxu1 }
 0x4a3   : > { %v4695_v40 = vpop.f32.mrb[54].mxu1  ;;  %v1845_v27 = vmax.f32 %v4691_v45, %v4693_v51 }
 0x4a4   : > { %v4699_v12 = vpop.f32.mrb[55].mxu1 }
 0x4a5   : > { %1846 = vmax.xlane.f32.xlu0 %v1845_v27  ;;  %v1848_v15 = vmax.f32 %v4695_v40, %v4699_v12 }
 0x4a7   : > { %1849 = vmax.xlane.f32.xlu1 %v1848_v15 }
 0x4a9   : > { %v4703_v13 = vpop.f32.mrb[56].mxu1 }
 0x4aa   : > { %v4705_v55 = vpop.f32.mrb[57].mxu1 }
 0x4ab   : > { %v4707_v32 = vpop.f32.mrb[58].mxu1  ;;  %v1851_v20 = vmax.f32 %v4703_v13, %v4705_v55 }
 0x4ac   : > { %v4711_v56 = vpop.f32.mrb[59].mxu1 }
 0x4ad   : > { %1852 = vmax.xlane.f32.xlu0 %v1851_v20  ;;  %v1854_v7 = vmax.f32 %v4707_v32, %v4711_v56 }
 0x4af   : > { %1855 = vmax.xlane.f32.xlu1 %v1854_v7 }
 0x4b1   : > { %v4715_v25 = vpop.f32.mrb[60].mxu1 }
 0x4b2   : > { %v4717_v35 = vpop.f32.mrb[61].mxu1 }
 0x4b3   : > { %v4719_v58 = vpop.f32.mrb[62].mxu1  ;;  %v1857_v61 = vmax.f32 %v4715_v25, %v4717_v35 }
 0x4b4   : > { %v4723_v49 = vpop.f32.mrb[63].mxu1 }
 0x4b5   : > { %1858 = vmax.xlane.f32.xlu0 %v1857_v61  ;;  %v1860_v43 = vmax.f32 %v4719_v58, %v4723_v49 }
 0x4b7   : > { %1861 = vmax.xlane.f32.xlu1 %v1860_v43 }
 0x4b9   : > { %v4727_v62 = vpop.f32.mrb[64].mxu1 }
 0x4ba   : > { %v4729_v39 = vpop.f32.mrb[65].mxu1 }
 0x4bb   : > { %v4731_v42 = vpop.f32.mrb[66].mxu1  ;;  %v1863_v31 = vmax.f32 %v4727_v62, %v4729_v39 }
 0x4bc   : > { %v4735_v9 = vpop.f32.mrb[67].mxu1 }
 0x4bd   : > { %1864 = vmax.xlane.f32.xlu0 %v1863_v31  ;;  %v1866_v38 = vmax.f32 %v4731_v42, %v4735_v9 }
 0x4bf   : > { %1867 = vmax.xlane.f32.xlu1 %v1866_v38 }
 0x4c1   : > { %v4739_v48 = vpop.f32.mrb[68].mxu1 }
 0x4c2   : > { %v4741_v54 = vpop.f32.mrb[69].mxu1 }
 0x4c3   : > { %v4743_v14 = vpop.f32.mrb[70].mxu1  ;;  %v1869_v19 = vmax.f32 %v4739_v48, %v4741_v54 }
 0x4c4   : > { %v4747_v29 = vpop.f32.mrb[71].mxu1 }
 0x4c5   : > { %5383 = vst [vmem:[#allocation2_spill] sm:$0xff] %v4747_v29  ;;  %1870 = vmax.xlane.f32.xlu0 %v1869_v19  ;;  %v1872_v36 = vmax.f32 %v4743_v14, %v4747_v29 }
 0x4c7   : > { %1873 = vmax.xlane.f32.xlu1 %v1872_v36 }
 0x4c9   : > { %v4751_v8 = vpop.f32.mrb[72].mxu1 }
 0x4ca   : > { %5384 = vst [vmem:[#allocation3_spill] sm:$0xff] %v4751_v8  ;;  %v4753_v3 = vpop.f32.mrb[73].mxu1 }
 0x4cb   : > { %5385 = vst [vmem:[#allocation4_spill] sm:$0xff] %v4753_v3  ;;  %v4755_v11 = vpop.f32.mrb[74].mxu1  ;;  %v1875_v16 = vmax.f32 %v4751_v8, %v4753_v3 }
 0x4cc   : > { %5386 = vst [vmem:[#allocation5_spill] sm:$0xff] %v4755_v11  ;;  %v4759_v46 = vpop.f32.mrb[75].mxu1 }
 0x4cd   : > { %5387 = vst [vmem:[#allocation6_spill] sm:$0xff] %v4759_v46  ;;  %1876 = vmax.xlane.f32.xlu0 %v1875_v16  ;;  %v1878_v47 = vmax.f32 %v4755_v11, %v4759_v46 }
 0x4cf   : > { %1879 = vmax.xlane.f32.xlu1 %v1878_v47 }
 0x4d1   : > { %v4763_v18 = vpop.f32.mrb[76].mxu1 }
 0x4d2   : > { %5388 = vst [vmem:[#allocation7_spill] sm:$0xff] %v4763_v18  ;;  %v4765_v41 = vpop.f32.mrb[77].mxu1 }
 0x4d3   : > { %5389 = vst [vmem:[#allocation8_spill] sm:$0xff] %v4765_v41  ;;  %v4767_v57 = vpop.f32.mrb[78].mxu1  ;;  %v1881_v5 = vmax.f32 %v4763_v18, %v4765_v41 }
 0x4d4   : > { %5390 = vst [vmem:[#allocation9_spill] sm:$0xff] %v4767_v57  ;;  %v4771_v17 = vpop.f32.mrb[79].mxu1 }
 0x4d5   : > { %5391 = vst [vmem:[#allocation10_spill] sm:$0xff] %v4771_v17  ;;  %1882 = vmax.xlane.f32.xlu0 %v1881_v5  ;;  %v1884_v22 = vmax.f32 %v4767_v57, %v4771_v17 }
 0x4d7   : > { %1885 = vmax.xlane.f32.xlu1 %v1884_v22 }
 0x4d9   : > { %v4775_v33 = vpop.f32.mrb[80].mxu1 }
 0x4da   : > { %5392 = vst [vmem:[#allocation11_spill] sm:$0xff] %v4775_v33  ;;  %v4777_v59 = vpop.f32.mrb[81].mxu1 }
 0x4db   : > { %5393 = vst [vmem:[#allocation12_spill] sm:$0xff] %v4777_v59  ;;  %v4779_v0 = vpop.f32.mrb[82].mxu1  ;;  %v1887_v26 = vmax.f32 %v4775_v33, %v4777_v59 }
 0x4dc   : > { %5394 = vst [vmem:[#allocation13_spill] sm:$0xff] %v4779_v0  ;;  %v4783_v53 = vpop.f32.mrb[83].mxu1 }
 0x4dd   : > { %5395 = vst [vmem:[#allocation14_spill] sm:$0xff] %v4783_v53  ;;  %1888 = vmax.xlane.f32.xlu0 %v1887_v26  ;;  %v1890_v28 = vmax.f32 %v4779_v0, %v4783_v53 }
 0x4df   : > { %1891 = vmax.xlane.f32.xlu1 %v1890_v28 }
 0x4e1   : > { %v4787_v27 = vpop.f32.mrb[84].mxu1 }
 0x4e2   : > { %v4789_v15 = vpop.f32.mrb[85].mxu1 }
 0x4e3   : > { %v4791_v20 = vpop.f32.mrb[86].mxu1 }
 0x4e4   : > { %v4795_v61 = vpop.f32.mrb[87].mxu1 }
 0x4e9   : > { %v4799_v31 = vpop.f32.mrb[88].mxu1 }
 0x4ea   : > { %v4801_v38 = vpop.f32.mrb[89].mxu1 }
 0x4eb   : > { %v4803_v19 = vpop.f32.mrb[90].mxu1 }
 0x4ec   : > { %v4807_v16 = vpop.f32.mrb[91].mxu1 }
 0x4f1   : > { %v4811_v5 = vpop.f32.mrb[92].mxu1 }
 0x4f2   : > { %v4813_v22 = vpop.f32.mrb[93].mxu1 }
 0x4f3   : > { %v4815_v26 = vpop.f32.mrb[94].mxu1 }
 0x4f4   : > { %v4819_v43 = vpop.f32.mrb[95].mxu1 }
 0x4f9   : > { %v4823_v36 = vpop.f32.mrb[96].mxu1 }
 0x4fa   : > { %v4825_v53 = vpop.f32.mrb[97].mxu1 }
 0x4fb   : > { %v4827_v0 = vpop.f32.mrb[98].mxu1 }
 0x4fc   : > { %v4831_v59 = vpop.f32.mrb[99].mxu1 }
 0x512   : > { %v1823_v28 = vpop.xlane.xlu0 %1822 }
 0x513   : > { %v1917_v17 = vsub.f32 %v4643_v6, %v1823_v28  ;;  %v1918_v57 = vsub.f32 %v4645_v52, %v1823_v28 }
 0x515   : > { %v1981_v7 = vmul.f32 1.442695, %v1917_v17  ;;  %v1983_v41 = vmul.f32 1.442695, %v1918_v57 }
 0x516   : > { %v1826_v18 = vpop.xlane.xlu0 %1825 }
 0x517   : > { %3369 = vpow2.f32 %v1981_v7  ;;  %v1919_v46 = vsub.f32 %v4647_v21, %v1826_v18  ;;  %v1920_v11 = vsub.f32 %v4651_v2, %v1826_v18 }
 0x518   : > { %3371 = vpow2.f32 %v1983_v41 }
 0x519   : > { %v1985_v47 = vmul.f32 1.442695, %v1919_v46  ;;  %v1987_v3 = vmul.f32 1.442695, %v1920_v11 }
 0x51a   : > { %v1829_v8 = vpop.xlane.xlu1 %1828 }
 0x51b   : > { %3373 = vpow2.f32 %v1985_v47  ;;  %v1921_v33 = vsub.f32 %v4655_v37, %v1829_v8  ;;  %v1922_v29 = vsub.f32 %v4657_v24, %v1829_v8 }
 0x51c   : > { %3375 = vpow2.f32 %v1987_v3 }
 0x51d   : > { %v1989_v6 = vmul.f32 1.442695, %v1921_v33  ;;  %v1991_v52 = vmul.f32 1.442695, %v1922_v29 }
 0x51e   : > { %v1832_v17 = vpop.xlane.xlu1 %1831 }
 0x51f   : > { %3377 = vpow2.f32 %v1989_v6  ;;  %v1923_v57 = vsub.f32 %v4659_v30, %v1832_v17  ;;  %v1924_v21 = vsub.f32 %v4663_v44, %v1832_v17 }
 0x520   : > { %3379 = vpow2.f32 %v1991_v52  ;;  %v5396_v52 = vmax.f32 %v4787_v27, %v4789_v15 }
 0x521   : > { %v4843_v2 = vpop.eup %3369  ;;  %v1993_v46 = vmul.f32 1.442695, %v1923_v57  ;;  %v1995_v11 = vmul.f32 1.442695, %v1924_v21 }
 0x522   : > { %v4845_v18 = vpop.eup %3371  ;;  %v1835_v41 = vpop.xlane.xlu0 %1834 }
 0x523   : > { %3381 = vpow2.f32 %v1993_v46  ;;  %v1925_v37 = vsub.f32 %v4667_v60, %v1835_v41  ;;  %v1926_v24 = vsub.f32 %v4669_v10, %v1835_v41  ;;  %v2109_v29 = vadd.f32 %v4845_v18, %v4843_v2 }
 0x524   : > { %3383 = vpow2.f32 %v1995_v11  ;;  %v1838_v30 = vpop.xlane.xlu1 %1837 }
 0x525   : > { %v4851_v8 = vpop.eup %3373  ;;  %v1997_v44 = vmul.f32 1.442695, %v1925_v37  ;;  %v1999_v3 = vmul.f32 1.442695, %v1926_v24  ;;  %v1927_v33 = vsub.f32 %v4671_v1, %v1838_v30  ;;  %v1928_v7 = vsub.f32 %v4675_v63, %v1838_v30  ;;  %2110 = vadd.xlane.f32.xlu0 %v2109_v29 }
 0x526   : > { %v4855_v47 = vpop.eup %3375  ;;  %v5397_v30 = vmax.f32 %v4791_v20, %v4795_v61 }
 0x527   : > { %3385 = vpow2.f32 %v1997_v44  ;;  %v2001_v60 = vmul.f32 1.442695, %v1927_v33  ;;  %v2003_v28 = vmul.f32 1.442695, %v1928_v7  ;;  %v2112_v10 = vadd.f32 %v4855_v47, %v4851_v8 }
 0x528   : > { %3387 = vpow2.f32 %v1999_v3 }
 0x529   : > { %v4859_v6 = vpop.eup %3377  ;;  %3389 = vpow2.f32 %v2001_v60  ;;  %2113 = vadd.xlane.f32.xlu1 %v2112_v10  ;;  %1894 = vmax.xlane.f32.xlu0 %v5396_v52 }
 0x52a   : > { %v4864_v1 = vpop.eup %3379  ;;  %3391 = vpow2.f32 %v2003_v28  ;;  %v1841_v63 = vpop.xlane.xlu0 %1840 }
 0x52b   : > { %v1929_v17 = vsub.f32 %v4679_v23, %v1841_v63  ;;  %v1930_v57 = vsub.f32 %v4681_v34, %v1841_v63  ;;  %v2115_v21 = vadd.f32 %v4864_v1, %v4859_v6 }
 0x52c   : > { %v1844_v46 = vpop.xlane.xlu1 %1843 }
 0x52d   : > { %v4870_v11 = vpop.eup %3381  ;;  %v2005_v41 = vmul.f32 1.442695, %v1929_v17  ;;  %v2007_v37 = vmul.f32 1.442695, %v1930_v57  ;;  %v1931_v24 = vsub.f32 %v4683_v50, %v1844_v46  ;;  %v1932_v29 = vsub.f32 %v4687_v4, %v1844_v46  ;;  %2116 = vadd.xlane.f32.xlu0 %v2115_v21  ;;  %1897 = vmax.xlane.f32.xlu1 %v5397_v30 }
 0x52e   : > { %v4877_v23 = vpop.eup %3383  ;;  %v5398_v50 = vmax.f32 %v4799_v31, %v4801_v38 }
 0x52f   : > { %3393 = vpow2.f32 %v2005_v41  ;;  %v2009_v34 = vmul.f32 1.442695, %v1931_v24  ;;  %v2011_v44 = vmul.f32 1.442695, %v1932_v29  ;;  %v2118_v3 = vadd.f32 %v4877_v23, %v4870_v11 }
 0x530   : > { %3395 = vpow2.f32 %v2007_v37  ;;  %v5399_v37 = vmax.f32 %v4803_v19, %v4807_v16 }
 0x531   : > { %v4881_v33 = vpop.eup %3385  ;;  %3397 = vpow2.f32 %v2009_v34  ;;  %2119 = vadd.xlane.f32.xlu1 %v2118_v3  ;;  %1900 = vmax.xlane.f32.xlu0 %v5398_v50 }
 0x532   : > { %v4886_v4 = vpop.eup %3387  ;;  %3399 = vpow2.f32 %v2011_v44  ;;  %v1847_v7 = vpop.xlane.xlu0 %1846 }
 0x533   : > { %v4888_v60 = vpop.eup %3389  ;;  %v1933_v28 = vsub.f32 %v4691_v45, %v1847_v7  ;;  %v1934_v10 = vsub.f32 %v4693_v51, %v1847_v7  ;;  %v2121_v52 = vadd.f32 %v4886_v4, %v4881_v33 }
 0x534   : > { %v4894_v63 = vpop.eup %3391  ;;  %v1850_v17 = vpop.xlane.xlu1 %1849 }
 0x535   : > { %v2013_v57 = vmul.f32 1.442695, %v1933_v28  ;;  %v2015_v21 = vmul.f32 1.442695, %v1934_v10  ;;  %v1935_v46 = vsub.f32 %v4695_v40, %v1850_v17  ;;  %v1936_v41 = vsub.f32 %v4699_v12, %v1850_v17  ;;  %2122 = vadd.xlane.f32.xlu0 %v2121_v52  ;;  %1903 = vmax.xlane.f32.xlu1 %v5399_v37 }
 0x536   : > { %v2124_v24 = vadd.f32 %v4894_v63, %v4888_v60  ;;  %v5400_v40 = vmax.f32 %v4811_v5, %v4813_v22 }
 0x537   : > { %3401 = vpow2.f32 %v2013_v57  ;;  %v2017_v45 = vmul.f32 1.442695, %v1935_v46  ;;  %v2019_v51 = vmul.f32 1.442695, %v1936_v41 }
 0x538   : > { %3403 = vpow2.f32 %v2015_v21  ;;  %v5401_v21 = vmax.f32 %v4815_v26, %v4819_v43 }
 0x539   : > { %v4903_v29 = vpop.eup %3393  ;;  %3405 = vpow2.f32 %v2017_v45  ;;  %2125 = vadd.xlane.f32.xlu1 %v2124_v24  ;;  %1906 = vmax.xlane.f32.xlu0 %v5400_v40 }
 0x53a   : > { %v4908_v12 = vpop.eup %3395  ;;  %3407 = vpow2.f32 %v2019_v51  ;;  %v1853_v30 = vpop.xlane.xlu0 %1852 }
 0x53b   : > { %v4910_v34 = vpop.eup %3397  ;;  %v1937_v44 = vsub.f32 %v4703_v13, %v1853_v30  ;;  %v1938_v3 = vsub.f32 %v4705_v55, %v1853_v30  ;;  %v2127_v50 = vadd.f32 %v4908_v12, %v4903_v29 }
 0x53c   : > { %v4916_v7 = vpop.eup %3399  ;;  %v1856_v28 = vpop.xlane.xlu1 %1855 }
 0x53d   : > { %v2021_v10 = vmul.f32 1.442695, %v1937_v44  ;;  %v2023_v52 = vmul.f32 1.442695, %v1938_v3  ;;  %v1939_v17 = vsub.f32 %v4707_v32, %v1856_v28  ;;  %v1940_v57 = vsub.f32 %v4711_v56, %v1856_v28  ;;  %2128 = vadd.xlane.f32.xlu0 %v2127_v50  ;;  %1909 = vmax.xlane.f32.xlu1 %v5401_v21 }
 0x53e   : > { %v2130_v46 = vadd.f32 %v4916_v7, %v4910_v34  ;;  %v5402_v32 = vmax.f32 %v4823_v36, %v4825_v53 }
 0x53f   : > { %3409 = vpow2.f32 %v2021_v10  ;;  %v2025_v13 = vmul.f32 1.442695, %v1939_v17  ;;  %v2027_v55 = vmul.f32 1.442695, %v1940_v57 }
 0x540   : > { %3411 = vpow2.f32 %v2023_v52  ;;  %v5403_v52 = vmax.f32 %v4827_v0, %v4831_v59 }
 0x541   : > { %v4925_v41 = vpop.eup %3401  ;;  %3413 = vpow2.f32 %v2025_v13  ;;  %2131 = vadd.xlane.f32.xlu1 %v2130_v46  ;;  %1912 = vmax.xlane.f32.xlu0 %v5402_v32 }
 0x542   : > { %v4930_v56 = vpop.eup %3403  ;;  %3415 = vpow2.f32 %v2027_v55  ;;  %v1859_v37 = vpop.xlane.xlu0 %1858 }
 0x543   : > { %v4932_v45 = vpop.eup %3405  ;;  %v1941_v51 = vsub.f32 %v4715_v25, %v1859_v37  ;;  %v1942_v24 = vsub.f32 %v4717_v35, %v1859_v37  ;;  %v2133_v40 = vadd.f32 %v4930_v56, %v4925_v41 }
 0x544   : > { %v4938_v30 = vpop.eup %3407  ;;  %v1862_v44 = vpop.xlane.xlu1 %1861 }
 0x545   : > { %v2029_v3 = vmul.f32 1.442695, %v1941_v51  ;;  %v2031_v50 = vmul.f32 1.442695, %v1942_v24  ;;  %v1943_v28 = vsub.f32 %v4719_v58, %v1862_v44  ;;  %v1944_v10 = vsub.f32 %v4723_v49, %v1862_v44  ;;  %2134 = vadd.xlane.f32.xlu0 %v2133_v40  ;;  %1915 = vmax.xlane.f32.xlu1 %v5403_v52 }
 0x546   : > { %v2136_v17 = vadd.f32 %v4938_v30, %v4932_v45 }
 0x547   : > { %3417 = vpow2.f32 %v2029_v3  ;;  %v2033_v25 = vmul.f32 1.442695, %v1943_v28  ;;  %v2035_v35 = vmul.f32 1.442695, %v1944_v10 }
 0x548   : > { %3419 = vpow2.f32 %v2031_v50 }
 0x549   : > { %v4947_v57 = vpop.eup %3409  ;;  %3421 = vpow2.f32 %v2033_v25  ;;  %2137 = vadd.xlane.f32.xlu1 %v2136_v17 }
 0x54a   : > { %v4949_v21 = vpop.eup %3411  ;;  %3423 = vpow2.f32 %v2035_v35  ;;  %v1865_v58 = vpop.xlane.xlu0 %1864 }
 0x54b   : > { %v4951_v49 = vpop.eup %3413  ;;  %v1945_v13 = vsub.f32 %v4727_v62, %v1865_v58  ;;  %v1946_v55 = vsub.f32 %v4729_v39, %v1865_v58  ;;  %v2139_v46 = vadd.f32 %v4949_v21, %v4947_v57 }
 0x54c   : > { %v4957_v32 = vpop.eup %3415  ;;  %v1868_v37 = vpop.xlane.xlu1 %1867 }
 0x54d   : > { %v2037_v51 = vmul.f32 1.442695, %v1945_v13  ;;  %v2039_v24 = vmul.f32 1.442695, %v1946_v55  ;;  %v1947_v40 = vsub.f32 %v4731_v42, %v1868_v37  ;;  %v1948_v44 = vsub.f32 %v4735_v9, %v1868_v37  ;;  %2140 = vadd.xlane.f32.xlu0 %v2139_v46  ;;  %v5404_v46 = vld [vmem:[#allocation2_spill] sm:$0xff] }
 0x54e   : > { %v2142_v3 = vadd.f32 %v4957_v32, %v4951_v49 }
 0x54f   : > { %3425 = vpow2.f32 %v2037_v51  ;;  %v2041_v62 = vmul.f32 1.442695, %v1947_v40  ;;  %v2043_v50 = vmul.f32 1.442695, %v1948_v44 }
 0x550   : > { %3427 = vpow2.f32 %v2039_v24  ;;  %2143 = vadd.xlane.f32.xlu1 %v2142_v3 }
 0x551   : > { %v4963_v39 = vpop.eup %3417  ;;  %3429 = vpow2.f32 %v2041_v62 }
 0x552   : > { %v4965_v28 = vpop.eup %3419  ;;  %3431 = vpow2.f32 %v2043_v50  ;;  %v1871_v10 = vpop.xlane.xlu0 %1870  ;;  %v5408_v50 = vld [vmem:[#allocation4_spill] sm:$0xff] }
 0x553   : > { %v4967_v52 = vpop.eup %3421  ;;  %v1949_v42 = vsub.f32 %v4739_v48, %v1871_v10  ;;  %v1950_v9 = vsub.f32 %v4741_v54, %v1871_v10  ;;  %v2145_v25 = vadd.f32 %v4965_v28, %v4963_v39 }
 0x554   : > { %v4973_v35 = vpop.eup %3423  ;;  %v1874_v17 = vpop.xlane.xlu1 %1873 }
 0x555   : > { %v2045_v58 = vmul.f32 1.442695, %v1949_v42  ;;  %v2047_v13 = vmul.f32 1.442695, %v1950_v9  ;;  %v1951_v55 = vsub.f32 %v4743_v14, %v1874_v17  ;;  %v1952_v37 = vsub.f32 %v5404_v46, %v1874_v17  ;;  %2146 = vadd.xlane.f32.xlu0 %v2145_v25  ;;  %v5407_v14 = vld [vmem:[#allocation3_spill] sm:$0xff]  ;;  %v5411_v46 = vld [vmem:[#allocation6_spill] sm:$0xff] }
 0x556   : > { %v2148_v51 = vadd.f32 %v4973_v35, %v4967_v52 }
 0x557   : > { %3433 = vpow2.f32 %v2045_v58  ;;  %v2049_v48 = vmul.f32 1.442695, %v1951_v55  ;;  %v2051_v24 = vmul.f32 1.442695, %v1952_v37 }
 0x558   : > { %3435 = vpow2.f32 %v2047_v13  ;;  %2149 = vadd.xlane.f32.xlu1 %v2148_v51  ;;  %v5410_v13 = vld [vmem:[#allocation5_spill] sm:$0xff] }
 0x559   : > { %v4979_v54 = vpop.eup %3425  ;;  %3437 = vpow2.f32 %v2049_v48 }
 0x55a   : > { %5405 = vst [vmem:[#allocation2_spill] sm:$0xff] %v4979_v54  ;;  %v4981_v40 = vpop.eup %3427  ;;  %3439 = vpow2.f32 %v2051_v24  ;;  %v1877_v44 = vpop.xlane.xlu0 %1876 }
 0x55b   : > { %v4983_v3 = vpop.eup %3429  ;;  %v1953_v62 = vsub.f32 %v5407_v14, %v1877_v44  ;;  %v1954_v10 = vsub.f32 %v5408_v50, %v1877_v44  ;;  %v2151_v42 = vadd.f32 %v4981_v40, %v4979_v54  ;;  %v5419_v54 = vld [vmem:[#allocation10_spill] sm:$0xff] }
 0x55c   : > { %5406 = vst [vmem:[#allocation15_spill] sm:$0xff] %v4983_v3  ;;  %v4989_v9 = vpop.eup %3431  ;;  %v1880_v25 = vpop.xlane.xlu1 %1879 }
 0x55d   : > { %5409 = vst [vmem:[#allocation3_spill] sm:$0xff] %v4989_v9  ;;  %v2053_v17 = vmul.f32 1.442695, %v1953_v62  ;;  %v2055_v58 = vmul.f32 1.442695, %v1954_v10  ;;  %v1955_v55 = vsub.f32 %v5410_v13, %v1880_v25  ;;  %v1956_v37 = vsub.f32 %v5411_v46, %v1880_v25  ;;  %2152 = vadd.xlane.f32.xlu0 %v2151_v42  ;;  %v5415_v10 = vld [vmem:[#allocation7_spill] sm:$0xff] }
 0x55e   : > { %v2154_v51 = vadd.f32 %v4989_v9, %v4983_v3  ;;  %v5416_v42 = vld [vmem:[#allocation8_spill] sm:$0xff] }
 0x55f   : > { %3441 = vpow2.f32 %v2053_v17  ;;  %v2057_v48 = vmul.f32 1.442695, %v1955_v55  ;;  %v2059_v24 = vmul.f32 1.442695, %v1956_v37 }
 0x560   : > { %3443 = vpow2.f32 %v2055_v58  ;;  %2155 = vadd.xlane.f32.xlu1 %v2154_v51  ;;  %v5418_v51 = vld [vmem:[#allocation9_spill] sm:$0xff] }
 0x561   : > { %v4995_v44 = vpop.eup %3433  ;;  %3445 = vpow2.f32 %v2057_v48 }
 0x562   : > { %5412 = vst [vmem:[#allocation4_spill] sm:$0xff] %v4995_v44  ;;  %v4997_v14 = vpop.eup %3435  ;;  %3447 = vpow2.f32 %v2059_v24  ;;  %v1883_v62 = vpop.xlane.xlu0 %1882 }
 0x563   : > { %5413 = vst [vmem:[#allocation5_spill] sm:$0xff] %v4997_v14  ;;  %v4999_v50 = vpop.eup %3437  ;;  %v1957_v25 = vsub.f32 %v5415_v10, %v1883_v62  ;;  %v1958_v13 = vsub.f32 %v5416_v42, %v1883_v62  ;;  %v2157_v17 = vadd.f32 %v4997_v14, %v4995_v44  ;;  %v5422_v44 = vld [vmem:[#allocation13_spill] sm:$0xff] }
 0x564   : > { %5414 = vst [vmem:[#allocation6_spill] sm:$0xff] %v4999_v50  ;;  %v5005_v55 = vpop.eup %3439  ;;  %v1886_v58 = vpop.xlane.xlu1 %1885 }
 0x565   : > { %5417 = vst [vmem:[#allocation7_spill] sm:$0xff] %v5005_v55  ;;  %v2061_v46 = vmul.f32 1.442695, %v1957_v25  ;;  %v2063_v37 = vmul.f32 1.442695, %v1958_v13  ;;  %v1959_v48 = vsub.f32 %v5418_v51, %v1886_v58  ;;  %v1960_v3 = vsub.f32 %v5419_v54, %v1886_v58  ;;  %2158 = vadd.xlane.f32.xlu0 %v2157_v17  ;;  %v5420_v51 = vld [vmem:[#allocation11_spill] sm:$0xff] }
 0x566   : > { %v2160_v24 = vadd.f32 %v5005_v55, %v4999_v50  ;;  %v5421_v17 = vld [vmem:[#allocation12_spill] sm:$0xff]  ;;  %v5423_v50 = vld [vmem:[#allocation14_spill] sm:$0xff] }
 0x567   : > { %3449 = vpow2.f32 %v2061_v46  ;;  %v2065_v10 = vmul.f32 1.442695, %v1959_v48  ;;  %v2067_v9 = vmul.f32 1.442695, %v1960_v3 }
 0x568   : > { %3451 = vpow2.f32 %v2063_v37  ;;  %2161 = vadd.xlane.f32.xlu1 %v2160_v24 }
 0x569   : > { %v5011_v62 = vpop.eup %3441  ;;  %3453 = vpow2.f32 %v2065_v10 }
 0x56a   : > { %v5013_v42 = vpop.eup %3443  ;;  %3455 = vpow2.f32 %v2067_v9  ;;  %v1889_v25 = vpop.xlane.xlu0 %1888 }
 0x56b   : > { %v5015_v13 = vpop.eup %3445  ;;  %v1961_v54 = vsub.f32 %v5420_v51, %v1889_v25  ;;  %v1962_v58 = vsub.f32 %v5421_v17, %v1889_v25  ;;  %v2163_v46 = vadd.f32 %v5013_v42, %v5011_v62 }
 0x56c   : > { %v5021_v48 = vpop.eup %3447  ;;  %v1892_v3 = vpop.xlane.xlu1 %1891 }
 0x56d   : > { %v2069_v37 = vmul.f32 1.442695, %v1961_v54  ;;  %v2071_v24 = vmul.f32 1.442695, %v1962_v58  ;;  %v1963_v10 = vsub.f32 %v5422_v44, %v1892_v3  ;;  %v1964_v55 = vsub.f32 %v5423_v50, %v1892_v3  ;;  %2164 = vadd.xlane.f32.xlu0 %v2163_v46 }
 0x56e   : > { %v2166_v9 = vadd.f32 %v5021_v48, %v5015_v13 }
 0x56f   : > { %3457 = vpow2.f32 %v2069_v37  ;;  %v2073_v51 = vmul.f32 1.442695, %v1963_v10  ;;  %v2075_v14 = vmul.f32 1.442695, %v1964_v55 }
 0x570   : > { %3459 = vpow2.f32 %v2071_v24  ;;  %2167 = vadd.xlane.f32.xlu1 %v2166_v9 }
 0x571   : > { %v5027_v25 = vpop.eup %3449  ;;  %3461 = vpow2.f32 %v2073_v51 }
 0x572   : > { %5424 = vst [vmem:[#allocation8_spill] sm:$0xff] %v5027_v25  ;;  %v5029_v17 = vpop.eup %3451  ;;  %3463 = vpow2.f32 %v2075_v14 }
 0x573   : > { %v5031_v54 = vpop.eup %3453  ;;  %v2169_v44 = vadd.f32 %v5029_v17, %v5027_v25 }
 0x574   : > { %5425 = vst [vmem:[#allocation9_spill] sm:$0xff] %v5031_v54  ;;  %v5035_v50 = vpop.eup %3455 }
 0x575   : > { %5426 = vst [vmem:[#allocation10_spill] sm:$0xff] %v5035_v50  ;;  %2170 = vadd.xlane.f32.xlu0 %v2169_v44  ;;  %v2172_v58 = vadd.f32 %v5035_v50, %v5031_v54 }
 0x577   : > { %2173 = vadd.xlane.f32.xlu1 %v2172_v58 }
 0x579   : > { %v5039_v55 = vpop.eup %3457 }
 0x57a   : > { %5427 = vst [vmem:[#allocation11_spill] sm:$0xff] %v5039_v55  ;;  %v5041_v46 = vpop.eup %3459 }
 0x57b   : > { %5428 = vst [vmem:[#allocation12_spill] sm:$0xff] %v5041_v46  ;;  %v5043_v3 = vpop.eup %3461  ;;  %v2175_v14 = vadd.f32 %v5041_v46, %v5039_v55 }
 0x57c   : > { %5429 = vst [vmem:[#allocation13_spill] sm:$0xff] %v5043_v3  ;;  %v5047_v37 = vpop.eup %3463 }
 0x57d   : > { %5430 = vst [vmem:[#allocation14_spill] sm:$0xff] %v5047_v37  ;;  %2176 = vadd.xlane.f32.xlu0 %v2175_v14  ;;  %v2178_v24 = vadd.f32 %v5047_v37, %v5043_v3 }
 0x57f   : > { %2179 = vadd.xlane.f32.xlu1 %v2178_v24 }
 0x5b2   : > { %v2111_v10 = vpop.xlane.xlu0 %2110 }
 0x5b3   : > { %3465 = vrcp.f32 %v2111_v10 }
 0x5b6   : > { %v2114_v9 = vpop.xlane.xlu1 %2113  ;;  %v1895_v51 = vpop.xlane.xlu0 %1894 }
 0x5b7   : > { %3467 = vrcp.f32 %v2114_v9  ;;  %v1965_v44 = vsub.f32 %v4787_v27, %v1895_v51  ;;  %v1966_v58 = vsub.f32 %v4789_v15, %v1895_v51 }
 0x5b9   : > { %v2077_v25 = vmul.f32 1.442695, %v1965_v44  ;;  %v2079_v54 = vmul.f32 1.442695, %v1966_v58 }
 0x5ba   : > { %v2117_v50 = vpop.xlane.xlu0 %2116  ;;  %v1898_v55 = vpop.xlane.xlu1 %1897 }
 0x5bb   : > { %3469 = vpow2.f32 %v2077_v25  ;;  %v1967_v14 = vsub.f32 %v4791_v20, %v1898_v55  ;;  %v1968_v46 = vsub.f32 %v4795_v61, %v1898_v55 }
 0x5bc   : > { %3471 = vpow2.f32 %v2079_v54 }
 0x5bd   : > { %3473 = vrcp.f32 %v2117_v50  ;;  %v2081_v24 = vmul.f32 1.442695, %v1967_v14  ;;  %v2083_v10 = vmul.f32 1.442695, %v1968_v46  ;;  %v3466_v9 = vpop.eup %3465 }
 0x5be   : > { %v2120_v3 = vpop.xlane.xlu1 %2119  ;;  %v1901_v37 = vpop.xlane.xlu0 %1900  ;;  %v2237_v20 = vmul.f32 %v3466_v9, %v4843_v2  ;;  %v2238_v55 = vmul.f32 %v3466_v9, %v4845_v18 }
 0x5bf   : > { %3475 = vpow2.f32 %v2081_v24  ;;  %v1969_v27 = vsub.f32 %v4799_v31, %v1901_v37  ;;  %v1970_v15 = vsub.f32 %v4801_v38, %v1901_v37 }
 0x5c0   : > { %3477 = vpow2.f32 %v2083_v10 }
 0x5c1   : > { %v3468_v51 = vpop.eup %3467  ;;  %3479 = vrcp.f32 %v2120_v3  ;;  %v2085_v25 = vmul.f32 1.442695, %v1969_v27  ;;  %v2087_v44 = vmul.f32 1.442695, %v1970_v15 }
 0x5c2   : > { %v2239_v61 = vmul.f32 %v3468_v51, %v4851_v8  ;;  %v2123_v54 = vpop.xlane.xlu0 %2122  ;;  %v1904_v50 = vpop.xlane.xlu1 %1903  ;;  %v2240_v46 = vmul.f32 %v3468_v51, %v4855_v47 }
 0x5c3   : > { %3481 = vpow2.f32 %v2085_v25  ;;  %v1971_v31 = vsub.f32 %v4803_v19, %v1904_v50  ;;  %v1972_v38 = vsub.f32 %v4807_v16, %v1904_v50 }
 0x5c4   : > { %3483 = vpow2.f32 %v2087_v44  ;;  %v2302_v37 = vpack.c.bf16 %v2240_v46, %v2238_v55  ;;  %v2301_v3 = vpack.c.bf16 %v2239_v61, %v2237_v20 }
 0x5c5   : > { %v5063_v58 = vpop.eup %3469  ;;  %3485 = vrcp.f32 %v2123_v54  ;;  %v2089_v2 = vmul.f32 1.442695, %v1971_v31  ;;  %v2091_v14 = vmul.f32 1.442695, %v1972_v38 }
 0x5c6   : > { %v5065_v8 = vpop.eup %3471  ;;  %2381 = vmatprep.mubr.bf16.mxu0 %v2302_v37  ;;  %v2126_v24 = vpop.xlane.xlu1 %2125 }
 0x5c7   : > { %v1907_v18 = vpop.xlane.xlu0 %1906  ;;  %v3474_v10 = vpop.eup %3473  ;;  %3487 = vpow2.f32 %v2089_v2  ;;  %2382 = vmatmul.mubr.bf16.vlgmr.msra.gmra.mrb[68].mxu0 %v2301_v3  ;;  %v2181_v16 = vadd.f32 %v5065_v8, %v5063_v58 }
 0x5c8   : > { %v1973_v47 = vsub.f32 %v4811_v5, %v1907_v18  ;;  %v1974_v19 = vsub.f32 %v4813_v22, %v1907_v18  ;;  %3489 = vpow2.f32 %v2091_v14  ;;  %v2242_v20 = vmul.f32 %v3474_v10, %v4864_v1 }
 0x5c9   : > { %v5071_v9 = vpop.eup %3475  ;;  %3491 = vrcp.f32 %v2126_v24  ;;  %2182 = vadd.xlane.f32.xlu0 %v2181_v16  ;;  %v2241_v55 = vmul.f32 %v3474_v10, %v4859_v6 }
 0x5ca   : > { %v2093_v27 = vmul.f32 1.442695, %v1973_v47  ;;  %v2095_v15 = vmul.f32 1.442695, %v1974_v19  ;;  %v5073_v51 = vpop.eup %3477  ;;  %v1910_v44 = vpop.xlane.xlu1 %1909 }
 0x5cb   : > { %v2129_v25 = vpop.xlane.xlu0 %2128  ;;  %v3480_v5 = vpop.eup %3479  ;;  %v1975_v22 = vsub.f32 %v4815_v26, %v1910_v44  ;;  %v1976_v61 = vsub.f32 %v4819_v43, %v1910_v44  ;;  %v2184_v54 = vadd.f32 %v5073_v51, %v5071_v9 }
 0x5cc   : > { %3493 = vpow2.f32 %v2093_v27  ;;  %v2244_v50 = vmul.f32 %v3480_v5, %v4877_v23  ;;  %v2243_v46 = vmul.f32 %v3480_v5, %v4870_v11 }
 0x5cd   : > { %3495 = vpow2.f32 %v2095_v15  ;;  %v5083_v31 = vpop.eup %3481  ;;  %v2097_v38 = vmul.f32 1.442695, %v1975_v22  ;;  %v2099_v1 = vmul.f32 1.442695, %v1976_v61  ;;  %2185 = vadd.xlane.f32.xlu1 %v2184_v54 }
 0x5ce   : > { %v5085_v37 = vpop.eup %3483  ;;  %3497 = vrcp.f32 %v2129_v25  ;;  %v2304_v26 = vpack.c.bf16 %v2244_v50, %v2242_v20  ;;  %v2132_v43 = vpop.xlane.xlu1 %2131  ;;  %v2303_v2 = vpack.c.bf16 %v2243_v46, %v2241_v55 }
 0x5cf   : > { %v1913_v3 = vpop.xlane.xlu0 %1912  ;;  %v3486_v14 = vpop.eup %3485  ;;  %3499 = vpow2.f32 %v2097_v38  ;;  %v2187_v11 = vadd.f32 %v5085_v37, %v5083_v31 }
 0x5d0   : > { %v1977_v23 = vsub.f32 %v4823_v36, %v1913_v3  ;;  %v1978_v6 = vsub.f32 %v4825_v53, %v1913_v3  ;;  %3501 = vpow2.f32 %v2099_v1  ;;  %2389 = vmatprep.mubr.bf16.mxu0 %v2304_v26  ;;  %v2246_v16 = vmul.f32 %v3486_v14, %v4886_v4 }
 0x5d1   : > { %v5091_v24 = vpop.eup %3487  ;;  %3503 = vrcp.f32 %v2132_v43  ;;  %2390 = vmatmul.mubr.bf16.gmra.mrb[72].mxu0 %v2303_v2  ;;  %2188 = vadd.xlane.f32.xlu0 %v2187_v11  ;;  %v2245_v20 = vmul.f32 %v3486_v14, %v4881_v33 }
 0x5d2   : > { %v2101_v18 = vmul.f32 1.442695, %v1977_v23  ;;  %v2103_v10 = vmul.f32 1.442695, %v1978_v6  ;;  %v5093_v47 = vpop.eup %3489  ;;  %v1916_v19 = vpop.xlane.xlu1 %1915 }
 0x5d3   : > { %v3492_v36 = vpop.eup %3491  ;;  %v2135_v53 = vpop.xlane.xlu0 %2134  ;;  %v1979_v27 = vsub.f32 %v4827_v0, %v1916_v19  ;;  %v1980_v15 = vsub.f32 %v4831_v59, %v1916_v19  ;;  %v2190_v25 = vadd.f32 %v5093_v47, %v5091_v24 }
 0x5d4   : > { %3505 = vpow2.f32 %v2101_v18  ;;  %v2248_v44 = vmul.f32 %v3492_v36, %v4894_v63  ;;  %v2247_v5 = vmul.f32 %v3492_v36, %v4888_v60 }
 0x5d5   : > { %3507 = vpow2.f32 %v2103_v10  ;;  %v2105_v4 = vmul.f32 1.442695, %v1979_v27  ;;  %v2107_v61 = vmul.f32 1.442695, %v1980_v15  ;;  %2191 = vadd.xlane.f32.xlu1 %v2190_v25 }
 0x5d6   : > { %v5103_v22 = vpop.eup %3493  ;;  %3509 = vrcp.f32 %v2135_v53  ;;  %v2306_v0 = vpack.c.bf16 %v2248_v44, %v2246_v16  ;;  %v2138_v59 = vpop.xlane.xlu1 %2137  ;;  %v2305_v50 = vpack.c.bf16 %v2247_v5, %v2245_v20 }
 0x5d7   : > { %v5105_v54 = vpop.eup %3495  ;;  %3511 = vpow2.f32 %v2105_v4 }
 0x5d8   : > { %v2193_v55 = vadd.f32 %v5105_v54, %v5103_v22  ;;  %v3498_v63 = vpop.eup %3497  ;;  %3513 = vpow2.f32 %v2107_v61  ;;  %2397 = vmatprep.mubr.bf16.mxu0 %v2306_v0 }
 0x5d9   : > { %v5109_v33 = vpop.eup %3499  ;;  %3515 = vrcp.f32 %v2138_v59  ;;  %2398 = vmatmul.mubr.bf16.gmra.mrb[76].mxu0 %v2305_v50  ;;  %v2250_v26 = vmul.f32 %v3498_v63, %v4908_v12  ;;  %v2249_v3 = vmul.f32 %v3498_v63, %v4903_v29 }
 0x5da   : > { %2194 = vadd.xlane.f32.xlu0 %v2193_v55  ;;  %v5111_v60 = vpop.eup %3501  ;;  %v2141_v46 = vpop.xlane.xlu0 %2140 }
 0x5db   : > { %v3504_v38 = vpop.eup %3503  ;;  %v2196_v1 = vadd.f32 %v5111_v60, %v5109_v33  ;;  %3517 = vrcp.f32 %v2141_v46 }
 0x5dc   : > { %v2252_v43 = vmul.f32 %v3504_v38, %v4916_v7  ;;  %v2251_v2 = vmul.f32 %v3504_v38, %v4910_v34 }
 0x5dd   : > { %2197 = vadd.xlane.f32.xlu1 %v2196_v1  ;;  %v2144_v23 = vpop.xlane.xlu1 %2143 }
 0x5de   : > { %v5119_v14 = vpop.eup %3505  ;;  %3519 = vrcp.f32 %v2144_v23  ;;  %v2308_v11 = vpack.c.bf16 %v2252_v43, %v2250_v26  ;;  %v2307_v18 = vpack.c.bf16 %v2251_v2, %v2249_v3  ;;  %v5431_v23 = vld [vmem:[#allocation3_spill] sm:$0xff] }
 0x5df   : > { %v5121_v6 = vpop.eup %3507 }
 0x5e0   : > { %v2199_v10 = vadd.f32 %v5121_v6, %v5119_v14  ;;  %v3510_v12 = vpop.eup %3509  ;;  %2405 = vmatprep.mubr.bf16.mxu0 %v2308_v11 }
 0x5e1   : > { %v5125_v19 = vpop.eup %3511  ;;  %2406 = vmatmul.mubr.bf16.gmra.mrb[80].mxu0 %v2307_v18  ;;  %v2254_v36 = vmul.f32 %v3510_v12, %v4930_v56  ;;  %v2253_v27 = vmul.f32 %v3510_v12, %v4925_v41  ;;  %v5432_v18 = vld [vmem:[#allocation15_spill] sm:$0xff]  ;;  %v5433_v12 = vld [vmem:[#allocation2_spill] sm:$0xff] }
 0x5e2   : > { %2200 = vadd.xlane.f32.xlu0 %v2199_v10  ;;  %v5127_v29 = vpop.eup %3513  ;;  %v2147_v34 = vpop.xlane.xlu0 %2146 }
 0x5e3   : > { %v3516_v7 = vpop.eup %3515  ;;  %v2202_v16 = vadd.f32 %v5127_v29, %v5125_v19  ;;  %3521 = vrcp.f32 %v2147_v34 }
 0x5e4   : > { %v2256_v53 = vmul.f32 %v3516_v7, %v4938_v30  ;;  %v2255_v15 = vmul.f32 %v3516_v7, %v4932_v45 }
 0x5e5   : > { %2203 = vadd.xlane.f32.xlu1 %v2202_v16  ;;  %v2150_v25 = vpop.xlane.xlu1 %2149  ;;  %v3518_v44 = vpop.eup %3517 }
 0x5e6   : > { %3523 = vrcp.f32 %v2150_v25  ;;  %v2310_v20 = vpack.c.bf16 %v2256_v53, %v2254_v36  ;;  %v2309_v5 = vpack.c.bf16 %v2255_v15, %v2253_v27  ;;  %v2258_v61 = vmul.f32 %v3518_v44, %v4949_v21  ;;  %v5434_v36 = vld [vmem:[#allocation5_spill] sm:$0xff]  ;;  %v5435_v27 = vld [vmem:[#allocation7_spill] sm:$0xff] }
 0x5e7   : > { %v2257_v45 = vmul.f32 %v3518_v44, %v4947_v57  ;;  %v5436_v44 = vld [vmem:[#allocation6_spill] sm:$0xff] }
 0x5e8   : > { %v3520_v4 = vpop.eup %3519  ;;  %2413 = vmatprep.mubr.bf16.mxu0 %v2310_v20 }
 0x5e9   : > { %2414 = vmatmul.mubr.bf16.gmra.mrb[84].mxu0 %v2309_v5  ;;  %v2260_v56 = vmul.f32 %v3520_v4, %v4957_v32  ;;  %v2259_v30 = vmul.f32 %v3520_v4, %v4951_v49  ;;  %v5437_v4 = vld [vmem:[#allocation4_spill] sm:$0xff] }
 0x5ea   : > { %v2153_v0 = vpop.xlane.xlu0 %2152 }
 0x5eb   : > { %v2312_v59 = vpack.c.bf16 %v2260_v56, %v2258_v61  ;;  %3525 = vrcp.f32 %v2153_v0  ;;  %v2311_v55 = vpack.c.bf16 %v2259_v30, %v2257_v45 }
 0x5ed   : > { %2421 = vmatprep.mubr.bf16.mxu0 %v2312_v59  ;;  %v2156_v41 = vpop.xlane.xlu1 %2155  ;;  %v3522_v50 = vpop.eup %3521 }
 0x5ee   : > { %3527 = vrcp.f32 %v2156_v41  ;;  %v2262_v46 = vmul.f32 %v3522_v50, %v4965_v28  ;;  %v2261_v26 = vmul.f32 %v3522_v50, %v4963_v39 }
 0x5f0   : > { %v3524_v63 = vpop.eup %3523 }
 0x5f1   : > { %2422 = vmatmul.mubr.bf16.gmra.mrb[88].mxu0 %v2311_v55  ;;  %v2264_v21 = vmul.f32 %v3524_v63, %v4973_v35  ;;  %v2263_v1 = vmul.f32 %v3524_v63, %v4967_v52 }
 0x5f2   : > { %v2159_v38 = vpop.xlane.xlu0 %2158 }
 0x5f3   : > { %v2314_v32 = vpack.c.bf16 %v2264_v21, %v2262_v46  ;;  %3529 = vrcp.f32 %v2159_v38  ;;  %v2313_v57 = vpack.c.bf16 %v2263_v1, %v2261_v26 }
 0x5f5   : > { %2429 = vmatprep.mubr.bf16.mxu0 %v2314_v32  ;;  %v2162_v49 = vpop.xlane.xlu1 %2161  ;;  %v3526_v43 = vpop.eup %3525 }
 0x5f6   : > { %3531 = vrcp.f32 %v2162_v49  ;;  %v2266_v2 = vmul.f32 %v3526_v43, %v4981_v40  ;;  %v2265_v34 = vmul.f32 %v3526_v43, %v5433_v12  ;;  %v5438_v49 = vld [vmem:[#allocation10_spill] sm:$0xff] }
 0x5f8   : > { %v3528_v3 = vpop.eup %3527 }
 0x5f9   : > { %2430 = vmatmul.mubr.bf16.gmra.mrb[92].mxu0 %v2313_v57  ;;  %v2268_v28 = vmul.f32 %v3528_v3, %v5431_v23  ;;  %v2267_v10 = vmul.f32 %v3528_v3, %v5432_v18  ;;  %v5440_v3 = vld [vmem:[#allocation8_spill] sm:$0xff] }
 0x5fa   : > { %v2165_v11 = vpop.xlane.xlu0 %2164 }
 0x5fb   : > { %v2316_v35 = vpack.c.bf16 %v2268_v28, %v2266_v2  ;;  %3533 = vrcp.f32 %v2165_v11  ;;  %v2315_v39 = vpack.c.bf16 %v2267_v10, %v2265_v34  ;;  %v5441_v28 = vld [vmem:[#allocation12_spill] sm:$0xff]  ;;  %v5443_v10 = vld [vmem:[#allocation13_spill] sm:$0xff] }
 0x5fd   : > { %2437 = vmatprep.mubr.bf16.mxu0 %v2316_v35  ;;  %v2168_v52 = vpop.xlane.xlu1 %2167  ;;  %v3530_v7 = vpop.eup %3529  ;;  %v5442_v35 = vld [vmem:[#allocation14_spill] sm:$0xff] }
 0x5fe   : > { %3535 = vrcp.f32 %v2168_v52  ;;  %v2270_v53 = vmul.f32 %v3530_v7, %v5434_v36  ;;  %v2269_v61 = vmul.f32 %v3530_v7, %v5437_v4  ;;  %v5444_v52 = vld [vmem:[#allocation11_spill] sm:$0xff]  ;;  %v2526_v7 = vld [vmem:[%s5353_s10] sm:$0x3] }
 0x5ff   : > { %3356 = vmatprep.subr.msk.bf16.mxu1 %vm959_vm3, %v2526_v7 }
 0x600   : > { %v3532_v16 = vpop.eup %3531 }
 0x601   : > { %2438 = vmatmul.mubr.bf16.gmra.mrb[96].mxu0 %v2315_v39  ;;  %v2272_v40 = vmul.f32 %v3532_v16, %v5435_v27  ;;  %v2271_v20 = vmul.f32 %v3532_v16, %v5436_v44  ;;  %v2583_v39 = vsel %vm959_vm3, %v2526_v7, 0 }
 0x602   : > { %v2171_v15 = vpop.xlane.xlu0 %2170  ;;  %3312 = vmatpush3.bf16.msra.mxu1 %v2583_v39 }
 0x603   : > { %3537 = vrcp.f32 %v2171_v15  ;;  %v2318_v25 = vpack.c.bf16 %v2272_v40, %v2270_v53  ;;  %v2317_v0 = vpack.c.bf16 %v2271_v20, %v2269_v61 }
 0x604   : > { %v2174_v5 = vpop.xlane.xlu1 %2173 }
 0x605   : > { %2445 = vmatprep.mubr.bf16.mxu0 %v2318_v25  ;;  %3539 = vrcp.f32 %v2174_v5  ;;  %v3534_v56 = vpop.eup %3533 }
 0x606   : > { %v2274_v30 = vmul.f32 %v3534_v56, %v5013_v42  ;;  %v2273_v21 = vmul.f32 %v3534_v56, %v5011_v62 }
 0x608   : > { %v3536_v59 = vpop.eup %3535 }
 0x609   : > { %2446 = vmatmul.mubr.bf16.gmra.mrb[100].mxu0 %v2317_v0  ;;  %v2276_v41 = vmul.f32 %v3536_v59, %v5021_v48  ;;  %v2275_v55 = vmul.f32 %v3536_v59, %v5015_v13  ;;  %v5439_v48 = vld [vmem:[#allocation9_spill] sm:$0xff] }
 0x60a   : > { %v2177_v45 = vpop.xlane.xlu0 %2176 }
 0x60b   : > { %3541 = vrcp.f32 %v2177_v45  ;;  %v2320_v50 = vpack.c.bf16 %v2276_v41, %v2274_v30  ;;  %v2319_v32 = vpack.c.bf16 %v2275_v55, %v2273_v21 }
 0x60c   : > { %v2180_v63 = vpop.xlane.xlu1 %2179 }
 0x60d   : > { %v3538_v46 = vpop.eup %3537  ;;  %2453 = vmatprep.mubr.bf16.mxu0 %v2320_v50  ;;  %3543 = vrcp.f32 %v2180_v63 }
 0x60e   : > { %v2278_v1 = vmul.f32 %v3538_v46, %v5029_v17  ;;  %v2277_v13 = vmul.f32 %v3538_v46, %v5440_v3 }
 0x60f   : > { %v3540_v38 = vpop.eup %3539 }
 0x610   : > { %v2280_v26 = vmul.f32 %v3540_v38, %v5438_v49  ;;  %v2279_v43 = vmul.f32 %v3540_v38, %v5439_v48 }
 0x611   : > { %2454 = vmatmul.mubr.bf16.gmra.mrb[104].mxu0 %v2319_v32 }
 0x612   : > { %v2322_v42 = vpack.c.bf16 %v2280_v26, %v2278_v1  ;;  %v2321_v23 = vpack.c.bf16 %v2279_v43, %v2277_v13 }
 0x614   : > { %2461 = vmatprep.mubr.bf16.mxu0 %v2322_v42 }
 0x615   : > { %v3542_v57 = vpop.eup %3541 }
 0x616   : > { %v2282_v11 = vmul.f32 %v3542_v57, %v5441_v28  ;;  %v2281_v12 = vmul.f32 %v3542_v57, %v5444_v52 }
 0x617   : > { %v3544_v2 = vpop.eup %3543 }
 0x618   : > { %v2284_v62 = vmul.f32 %v3544_v2, %v5442_v35  ;;  %v2283_v17 = vmul.f32 %v3544_v2, %v5443_v10 }
 0x619   : > { %2462 = vmatmul.mubr.bf16.gmra.mrb[108].mxu0 %v2321_v23 }
 0x61a   : > { %v2324_v18 = vpack.c.bf16 %v2284_v62, %v2282_v11  ;;  %v2323_v34 = vpack.c.bf16 %v2283_v17, %v2281_v12 }
 0x61c   : > { %2469 = vmatprep.mubr.bf16.mxu0 %v2324_v18 }
 0x621   : > { %2470 = vmatmul.mubr.bf16.gmra.mrb[112].mxu0 %v2323_v34 }
 0x656   : > { %v2183_v16 = vpop.xlane.xlu0 %2182 }
 0x657   : > { %3545 = vrcp.f32 %v2183_v16 }
 0x65a   : > { %v2186_v36 = vpop.xlane.xlu1 %2185 }
 0x65b   : > { %3547 = vrcp.f32 %v2186_v36 }
 0x65e   : > { %v2189_v53 = vpop.xlane.xlu0 %2188 }
 0x65f   : > { %3549 = vrcp.f32 %v2189_v53 }
 0x661   : > { %v3546_v40 = vpop.eup %3545 }
 0x662   : > { %v2192_v27 = vpop.xlane.xlu1 %2191  ;;  %v2286_v44 = vmul.f32 %v3546_v40, %v5065_v8  ;;  %v2285_v5 = vmul.f32 %v3546_v40, %v5063_v58 }
 0x663   : > { %3551 = vrcp.f32 %v2192_v27 }
 0x665   : > { %v3548_v15 = vpop.eup %3547 }
 0x666   : > { %v2288_v20 = vmul.f32 %v3548_v15, %v5073_v51  ;;  %v2287_v4 = vmul.f32 %v3548_v15, %v5071_v9 }
 0x667   : > { %v2195_v25 = vpop.xlane.xlu0 %2194 }
 0x668   : > { %v2326_v61 = vpack.c.bf16 %v2288_v20, %v2286_v44  ;;  %v2325_v56 = vpack.c.bf16 %v2287_v4, %v2285_v5  ;;  %3553 = vrcp.f32 %v2195_v25 }
 0x669   : > { %v3550_v59 = vpop.eup %3549 }
 0x66a   : > { %2477 = vmatprep.mubr.bf16.mxu0 %v2326_v61  ;;  %v2198_v0 = vpop.xlane.xlu1 %2197  ;;  %v2290_v45 = vmul.f32 %v3550_v59, %v5085_v37  ;;  %v2289_v51 = vmul.f32 %v3550_v59, %v5083_v31 }
 0x66b   : > { %3555 = vrcp.f32 %v2198_v0  ;;  %2478 = vmatmul.mubr.bf16.gmra.mrb[116].mxu0 %v2325_v56 }
 0x66d   : > { %v3552_v30 = vpop.eup %3551 }
 0x66e   : > { %v2292_v8 = vmul.f32 %v3552_v30, %v5093_v47  ;;  %v2291_v58 = vmul.f32 %v3552_v30, %v5091_v24 }
 0x66f   : > { %v2201_v41 = vpop.xlane.xlu0 %2200 }
 0x670   : > { %v2328_v50 = vpack.c.bf16 %v2292_v8, %v2290_v45  ;;  %v2327_v9 = vpack.c.bf16 %v2291_v58, %v2289_v51  ;;  %3557 = vrcp.f32 %v2201_v41 }
 0x672   : > { %2485 = vmatprep.mubr.bf16.mxu0 %v2328_v50  ;;  %v2204_v55 = vpop.xlane.xlu1 %2203  ;;  %v3554_v63 = vpop.eup %3553 }
 0x673   : > { %3559 = vrcp.f32 %v2204_v55  ;;  %2486 = vmatmul.mubr.bf16.gmra.mrb[120].mxu0 %v2327_v9  ;;  %v2294_v21 = vmul.f32 %v3554_v63, %v5105_v54  ;;  %v2293_v37 = vmul.f32 %v3554_v63, %v5103_v22 }
 0x675   : > { %v3556_v46 = vpop.eup %3555 }
 0x676   : > { %v2296_v38 = vmul.f32 %v3556_v46, %v5111_v60  ;;  %v2295_v47 = vmul.f32 %v3556_v46, %v5109_v33 }
 0x678   : > { %v2330_v31 = vpack.c.bf16 %v2296_v38, %v2294_v21  ;;  %v2329_v32 = vpack.c.bf16 %v2295_v47, %v2293_v37 }
 0x67a   : > { %2493 = vmatprep.mubr.bf16.mxu0 %v2330_v31  ;;  %v3558_v24 = vpop.eup %3557 }
 0x67b   : > { %2494 = vmatmul.mubr.bf16.gmra.mrb[124].mxu0 %v2329_v32  ;;  %v2298_v49 = vmul.f32 %v3558_v24, %v5121_v6  ;;  %v2297_v42 = vmul.f32 %v3558_v24, %v5119_v14 }
 0x67d   : > { %v3560_v1 = vpop.eup %3559 }
 0x67e   : > { %v2300_v26 = vmul.f32 %v3560_v1, %v5127_v29  ;;  %v2299_v54 = vmul.f32 %v3560_v1, %v5125_v19 }
 0x680   : > { %v2332_v48 = vpack.c.bf16 %v2300_v26, %v2298_v49  ;;  %v2331_v60 = vpack.c.bf16 %v2299_v54, %v2297_v42 }
 0x682   : > { %2501 = vmatprep.mubr.bf16.mxu0 %v2332_v48 }
 0x683   : > { %2502 = vmatmul.mubr.bf16.gmra.mrb[128].mxu0 %v2331_v60 }
 0x69a   : > { %v3086_v22 = vpop.f32.mrb[68].mxu0 }
 0x69b   : > { %v3087_v33 = vpop.f32.mrb[69].mxu0 }
 0x69c   : > { %v3088_v43 = vadd.f32 %v3087_v33, %v3086_v22  ;;  %v3089_v57 = vpop.f32.mrb[70].mxu0 }
 0x69d   : > { %v3090_v3 = vpop.f32.mrb[71].mxu0 }
 0x69e   : > { %v3091_v13 = vadd.f32 %v3090_v3, %v3089_v57 }
 0x6a0   : > { %v2510_v2 = vpack.c.bf16 %v3091_v13, %v3088_v43 }
 0x6a2   : > { %3313 = vmatprep.mubr.msk.bf16.mxu1 %vm448_vm2, %v2510_v2 }
 0x6a4   : > { %v3092_v6 = vpop.f32.mrb[72].mxu0 }
 0x6a5   : > { %v3093_v23 = vpop.f32.mrb[73].mxu0 }
 0x6a6   : > { %v3094_v29 = vadd.f32 %v3093_v23, %v3092_v6  ;;  %v3095_v28 = vpop.f32.mrb[74].mxu0 }
 0x6a7   : > { %v3096_v14 = vpop.f32.mrb[75].mxu0 }
 0x6a8   : > { %v3097_v11 = vadd.f32 %v3096_v14, %v3095_v28 }
 0x6aa   : > { %v2511_v19 = vpack.c.bf16 %v3097_v11, %v3094_v29 }
 0x6ac   : > { %v3098_v35 = vpop.f32.mrb[76].mxu0  ;;  %3314 = vmatmul.mubr.msk.bf16.vlgmr.msra.gmra.mrb[100].mxu1 %vm448_vm2, %v2511_v19 }
 0x6ad   : > { %v3099_v62 = vpop.f32.mrb[77].mxu0 }
 0x6ae   : > { %v3100_v18 = vadd.f32 %v3099_v62, %v3098_v35  ;;  %v3101_v10 = vpop.f32.mrb[78].mxu0 }
 0x6af   : > { %v3102_v17 = vpop.f32.mrb[79].mxu0 }
 0x6b0   : > { %v3103_v52 = vadd.f32 %v3102_v17, %v3101_v10 }
 0x6b2   : > { %v2512_v12 = vpack.c.bf16 %v3103_v52, %v3100_v18 }
 0x6b4   : > { %v3104_v34 = vpop.f32.mrb[80].mxu0  ;;  %3317 = vmatprep.mubr.msk.bf16.mxu1 %vm448_vm2, %v2512_v12 }
 0x6b5   : > { %v3105_v7 = vpop.f32.mrb[81].mxu0 }
 0x6b6   : > { %v3106_v39 = vadd.f32 %v3105_v7, %v3104_v34  ;;  %v3107_v16 = vpop.f32.mrb[82].mxu0 }
 0x6b7   : > { %v3108_v36 = vpop.f32.mrb[83].mxu0 }
 0x6b8   : > { %v3109_v53 = vadd.f32 %v3108_v36, %v3107_v16 }
 0x6ba   : > { %v2513_v27 = vpack.c.bf16 %v3109_v53, %v3106_v39 }
 0x6bc   : > { %v3110_v40 = vpop.f32.mrb[84].mxu0  ;;  %3318 = vmatmul.mubr.msk.bf16.gmra.mrb[104].mxu1 %vm448_vm2, %v2513_v27 }
 0x6bd   : > { %v3111_v15 = vpop.f32.mrb[85].mxu0 }
 0x6be   : > { %v3112_v25 = vadd.f32 %v3111_v15, %v3110_v40  ;;  %v3113_v44 = vpop.f32.mrb[86].mxu0 }
 0x6bf   : > { %v3114_v20 = vpop.f32.mrb[87].mxu0 }
 0x6c0   : > { %v3115_v5 = vadd.f32 %v3114_v20, %v3113_v44 }
 0x6c2   : > { %v2514_v4 = vpack.c.bf16 %v3115_v5, %v3112_v25 }
 0x6c4   : > { %v3116_v61 = vpop.f32.mrb[88].mxu0  ;;  %3321 = vmatprep.mubr.msk.bf16.mxu1 %vm448_vm2, %v2514_v4 }
 0x6c5   : > { %v3117_v56 = vpop.f32.mrb[89].mxu0 }
 0x6c6   : > { %v3118_v0 = vadd.f32 %v3117_v56, %v3116_v61  ;;  %v3119_v59 = vpop.f32.mrb[90].mxu0 }
 0x6c7   : > { %v3120_v30 = vpop.f32.mrb[91].mxu0 }
 0x6c8   : > { %v3121_v41 = vadd.f32 %v3120_v30, %v3119_v59 }
 0x6ca   : > { %v2515_v45 = vpack.c.bf16 %v3121_v41, %v3118_v0 }
 0x6cc   : > { %v3122_v8 = vpop.f32.mrb[92].mxu0  ;;  %3322 = vmatmul.mubr.msk.bf16.gmra.mrb[108].mxu1 %vm448_vm2, %v2515_v45 }
 0x6cd   : > { %v3123_v51 = vpop.f32.mrb[93].mxu0 }
 0x6ce   : > { %v3124_v58 = vadd.f32 %v3123_v51, %v3122_v8  ;;  %v3125_v50 = vpop.f32.mrb[94].mxu0 }
 0x6cf   : > { %v3126_v9 = vpop.f32.mrb[95].mxu0 }
 0x6d0   : > { %v3127_v55 = vadd.f32 %v3126_v9, %v3125_v50 }
 0x6d2   : > { %v2516_v63 = vpack.c.bf16 %v3127_v55, %v3124_v58 }
 0x6d4   : > { %v3128_v46 = vpop.f32.mrb[96].mxu0  ;;  %3325 = vmatprep.mubr.msk.bf16.mxu1 %vm448_vm2, %v2516_v63  ;;  %v5203_v63 = vld [vmem:[%s5354_s11] ss:$0 sm:$0xff] }
 0x6d5   : > { %v3129_v21 = vpop.f32.mrb[97].mxu0 }
 0x6d6   : > { %v3130_v38 = vadd.f32 %v3129_v21, %v3128_v46  ;;  %v3131_v37 = vpop.f32.mrb[98].mxu0 }
 0x6d7   : > { %v3132_v47 = vpop.f32.mrb[99].mxu0 }
 0x6d8   : > { %v3133_v31 = vadd.f32 %v3132_v47, %v3131_v37 }
 0x6da   : > { %v2517_v32 = vpack.c.bf16 %v3133_v31, %v3130_v38  ;;  %v3561_v31 = vld [vmem:[%s3687_s28 + $0x10] sm:$0xff] }
 0x6dc   : > { %v3134_v24 = vpop.f32.mrb[100].mxu0  ;;  %3326 = vmatmul.mubr.msk.bf16.gmra.mrb[112].mxu1 %vm448_vm2, %v2517_v32 }
 0x6dd   : > { %v3135_v1 = vpop.f32.mrb[101].mxu0 }
 0x6de   : > { %v3136_v49 = vadd.f32 %v3135_v1, %v3134_v24  ;;  %v3137_v26 = vpop.f32.mrb[102].mxu0 }
 0x6df   : > { %v3138_v42 = vpop.f32.mrb[103].mxu0 }
 0x6e0   : > { %v3139_v54 = vadd.f32 %v3138_v42, %v3137_v26 }
 0x6e2   : > { %v2518_v48 = vpack.c.bf16 %v3139_v54, %v3136_v49  ;;  %v3562_v49 = vld [vmem:[%s3687_s28] sm:$0xff]  ;;  %v3563_v54 = vld [vmem:[%s3687_s28 + $0x18] sm:$0xff] }
 0x6e4   : > { %v3140_v60 = vpop.f32.mrb[104].mxu0  ;;  %3329 = vmatprep.mubr.msk.bf16.mxu1 %vm448_vm2, %v2518_v48 }
 0x6e5   : > { %v3141_v22 = vpop.f32.mrb[105].mxu0 }
 0x6e6   : > { %v3142_v33 = vadd.f32 %v3141_v22, %v3140_v60  ;;  %v3143_v43 = vpop.f32.mrb[106].mxu0  ;;  %v3564_v60 = vld [vmem:[%s3687_s28 + $0x8] sm:$0xff] }
 0x6e7   : > { %v3144_v57 = vpop.f32.mrb[107].mxu0 }
 0x6e8   : > { %v3145_v3 = vadd.f32 %v3144_v57, %v3143_v43 }
 0x6ea   : > { %v2519_v13 = vpack.c.bf16 %v3145_v3, %v3142_v33 }
 0x6ec   : > { %v3146_v2 = vpop.f32.mrb[108].mxu0  ;;  %3330 = vmatmul.mubr.msk.bf16.gmra.mrb[116].mxu1 %vm448_vm2, %v2519_v13 }
 0x6ed   : > { %v3147_v6 = vpop.f32.mrb[109].mxu0 }
 0x6ee   : > { %v3148_v23 = vadd.f32 %v3147_v6, %v3146_v2  ;;  %v3149_v29 = vpop.f32.mrb[110].mxu0  ;;  %v3565_v2 = vld [vmem:[%s3687_s28 + $0x30] sm:$0xff] }
 0x6ef   : > { %v3150_v28 = vpop.f32.mrb[111].mxu0 }
 0x6f0   : > { %v3151_v14 = vadd.f32 %v3150_v28, %v3149_v29  ;;  %v3566_v28 = vld [vmem:[%s3687_s28 + $0x20] sm:$0xff] }
 0x6f2   : > { %v2520_v11 = vpack.c.bf16 %v3151_v14, %v3148_v23 }
 0x6f4   : > { %v3152_v19 = vpop.f32.mrb[112].mxu0  ;;  %3333 = vmatprep.mubr.msk.bf16.mxu1 %vm448_vm2, %v2520_v11 }
 0x6f5   : > { %v3153_v35 = vpop.f32.mrb[113].mxu0 }
 0x6f6   : > { %v3154_v62 = vadd.f32 %v3153_v35, %v3152_v19  ;;  %v3155_v18 = vpop.f32.mrb[114].mxu0  ;;  %v3567_v19 = vld [vmem:[%s3687_s28 + $0x38] sm:$0xff] }
 0x6f7   : > { %v3156_v10 = vpop.f32.mrb[115].mxu0 }
 0x6f8   : > { %v3157_v17 = vadd.f32 %v3156_v10, %v3155_v18 }
 0x6fa   : > { %v2521_v52 = vpack.c.bf16 %v3157_v17, %v3154_v62  ;;  %v3568_v62 = vld [vmem:[%s3687_s28 + $0x28] sm:$0xff] }
 0x6fc   : > { %3334 = vmatmul.mubr.msk.bf16.gmra.mrb[120].mxu1 %vm448_vm2, %v2521_v52 }
 0x73e   : > { %v3158_v12 = vpop.f32.mrb[116].mxu0 }
 0x73f   : > { %v3159_v34 = vpop.f32.mrb[117].mxu0 }
 0x740   : > { %v3160_v7 = vadd.f32 %v3159_v34, %v3158_v12  ;;  %v3161_v39 = vpop.f32.mrb[118].mxu0 }
 0x741   : > { %v3162_v16 = vpop.f32.mrb[119].mxu0 }
 0x742   : > { %v3163_v36 = vadd.f32 %v3162_v16, %v3161_v39 }
 0x744   : > { %v2522_v53 = vpack.c.bf16 %v3163_v36, %v3160_v7  ;;  %v3569_v7 = vld [vmem:[%s3687_s28 + $0x50] sm:$0xff] }
 0x746   : > { %v3164_v27 = vpop.f32.mrb[120].mxu0  ;;  %3337 = vmatprep.mubr.msk.bf16.mxu1 %vm448_vm2, %v2522_v53  ;;  %v3570_v53 = vld [vmem:[%s3687_s28 + $0x40] sm:$0xff] }
 0x747   : > { %v3165_v40 = vpop.f32.mrb[121].mxu0 }
 0x748   : > { %v3166_v15 = vadd.f32 %v3165_v40, %v3164_v27  ;;  %v3167_v25 = vpop.f32.mrb[122].mxu0 }
 0x749   : > { %v3168_v44 = vpop.f32.mrb[123].mxu0 }
 0x74a   : > { %v3169_v20 = vadd.f32 %v3168_v44, %v3167_v25  ;;  %v3572_v44 = vld [vmem:[%s3687_s28 + $0x48] sm:$0xff] }
 0x74c   : > { %v2523_v5 = vpack.c.bf16 %v3169_v20, %v3166_v15  ;;  %v3571_v15 = vld [vmem:[%s3687_s28 + $0x58] sm:$0xff] }
 0x74e   : > { %v3170_v4 = vpop.f32.mrb[124].mxu0  ;;  %3338 = vmatmul.mubr.msk.bf16.gmra.mrb[124].mxu1 %vm448_vm2, %v2523_v5 }
 0x74f   : > { %v3171_v61 = vpop.f32.mrb[125].mxu0 }
 0x750   : > { %v3172_v56 = vadd.f32 %v3171_v61, %v3170_v4  ;;  %v3173_v0 = vpop.f32.mrb[126].mxu0 }
 0x751   : > { %v3174_v59 = vpop.f32.mrb[127].mxu0 }
 0x752   : > { %v3175_v30 = vadd.f32 %v3174_v59, %v3173_v0  ;;  %v3573_v59 = vld [vmem:[%s3687_s28 + $0x70] sm:$0xff] }
 0x754   : > { %v2524_v41 = vpack.c.bf16 %v3175_v30, %v3172_v56 }
 0x756   : > { %v3176_v45 = vpop.f32.mrb[128].mxu0  ;;  %3341 = vmatprep.mubr.msk.bf16.mxu1 %vm448_vm2, %v2524_v41 }
 0x757   : > { %v3177_v8 = vpop.f32.mrb[129].mxu0 }
 0x758   : > { %v3178_v51 = vadd.f32 %v3177_v8, %v3176_v45  ;;  %v3179_v58 = vpop.f32.mrb[130].mxu0  ;;  %v3574_v8 = vld [vmem:[%s3687_s28 + $0x60] sm:$0xff] }
 0x759   : > { %v3180_v50 = vpop.f32.mrb[131].mxu0 }
 0x75a   : > { %v3181_v9 = vadd.f32 %v3180_v50, %v3179_v58  ;;  %v3575_v50 = vld [vmem:[%s3687_s28 + $0x78] sm:$0xff] }
 0x75c   : > { %v2525_v55 = vpack.c.bf16 %v3181_v9, %v3178_v51 }
 0x75e   : > { %3342 = vmatmul.mubr.msk.bf16.gmra.mrb[128].mxu1 %vm448_vm2, %v2525_v55  ;;  %v3576_v55 = vld [vmem:[%s3687_s28 + $0x68] sm:$0xff] }
 0x77f   : > { %v3315_v46 = vpop.f32.mrb[100].mxu1 }
 0x780   : > { %v2628_v21 = vadd.f32 %v3315_v46, %v5203_v63  ;;  %v2619_v38 = vpop.f32.mrb[101].mxu1 }
 0x781   : > { %v2620_v37 = vadd.f32 %v5203_v63, %v2619_v38  ;;  %v3316_v47 = vpop.f32.mrb[102].mxu1 }
 0x782   : > { %v2748_v32 = vadd.f32 %v3561_v31, %v2628_v21  ;;  %v2631_v24 = vadd.f32 %v3316_v47, %v5203_v63  ;;  %v2622_v1 = vpop.f32.mrb[103].mxu1 }
 0x783   : > { %v2746_v26 = vadd.f32 %v3562_v49, %v2620_v37  ;;  %v2623_v42 = vadd.f32 %v5203_v63, %v2622_v1 }
 0x784   : > { %2780 = vst.msk [vmem:[%s5211_s19 + $0x10] sm:$0xff] %vm448_vm2, %v2748_v32  ;;  %v2749_v48 = vadd.f32 %v3563_v54, %v2631_v24  ;;  %v3577_v32 = vld [vmem:[%s3687_s28 + $0x90] sm:$0xff] }
 0x785   : > { %2778 = vst.msk [vmem:[%s5211_s19] sm:$0xff] %vm448_vm2, %v2746_v26  ;;  %v2747_v22 = vadd.f32 %v3564_v60, %v2623_v42  ;;  %v3578_v26 = vld [vmem:[%s3687_s28 + $0x80] sm:$0xff] }
 0x786   : > { %2781 = vst.msk [vmem:[%s5211_s19 + $0x18] sm:$0xff] %vm448_vm2, %v2749_v48  ;;  %v3579_v48 = vld [vmem:[%s3687_s28 + $0x98] sm:$0xff] }
 0x787   : > { %2779 = vst.msk [vmem:[%s5211_s19 + $0x8] sm:$0xff] %vm448_vm2, %v2747_v22  ;;  %v3580_v22 = vld [vmem:[%s3687_s28 + $0x88] sm:$0xff] }
 0x78f   : > { %v3319_v33 = vpop.f32.mrb[104].mxu1 }
 0x790   : > { %v2644_v43 = vadd.f32 %v3319_v33, %v5203_v63  ;;  %v2635_v57 = vpop.f32.mrb[105].mxu1 }
 0x791   : > { %v2636_v3 = vadd.f32 %v5203_v63, %v2635_v57  ;;  %v3320_v13 = vpop.f32.mrb[106].mxu1 }
 0x792   : > { %v2752_v6 = vadd.f32 %v3565_v2, %v2644_v43  ;;  %v2647_v23 = vadd.f32 %v3320_v13, %v5203_v63  ;;  %v2638_v29 = vpop.f32.mrb[107].mxu1 }
 0x793   : > { %v2750_v14 = vadd.f32 %v3566_v28, %v2636_v3  ;;  %v2639_v11 = vadd.f32 %v5203_v63, %v2638_v29 }
 0x794   : > { %2784 = vst.msk [vmem:[%s5211_s19 + $0x30] sm:$0xff] %vm448_vm2, %v2752_v6  ;;  %v2753_v35 = vadd.f32 %v3567_v19, %v2647_v23  ;;  %v3581_v6 = vld [vmem:[%s3687_s28 + $0xb0] sm:$0xff] }
 0x795   : > { %2782 = vst.msk [vmem:[%s5211_s19 + $0x20] sm:$0xff] %vm448_vm2, %v2750_v14  ;;  %v2751_v18 = vadd.f32 %v3568_v62, %v2639_v11  ;;  %v3582_v14 = vld [vmem:[%s3687_s28 + $0xa0] sm:$0xff] }
 0x796   : > { %2785 = vst.msk [vmem:[%s5211_s19 + $0x38] sm:$0xff] %vm448_vm2, %v2753_v35  ;;  %v3583_v35 = vld [vmem:[%s3687_s28 + $0xb8] sm:$0xff] }
 0x797   : > { %2783 = vst.msk [vmem:[%s5211_s19 + $0x28] sm:$0xff] %vm448_vm2, %v2751_v18  ;;  %v3584_v18 = vld [vmem:[%s3687_s28 + $0xa8] sm:$0xff] }
 0x79f   : > { %v3323_v10 = vpop.f32.mrb[108].mxu1 }
 0x7a0   : > { %v2660_v17 = vadd.f32 %v3323_v10, %v5203_v63  ;;  %v2651_v52 = vpop.f32.mrb[109].mxu1 }
 0x7a1   : > { %v2652_v12 = vadd.f32 %v5203_v63, %v2651_v52  ;;  %v3324_v34 = vpop.f32.mrb[110].mxu1 }
 0x7a2   : > { %v2756_v39 = vadd.f32 %v3569_v7, %v2660_v17  ;;  %v2663_v16 = vadd.f32 %v3324_v34, %v5203_v63  ;;  %v2654_v36 = vpop.f32.mrb[111].mxu1 }
 0x7a3   : > { %v2754_v27 = vadd.f32 %v3570_v53, %v2652_v12  ;;  %v2655_v40 = vadd.f32 %v5203_v63, %v2654_v36 }
 0x7a4   : > { %2788 = vst.msk [vmem:[%s5211_s19 + $0x50] sm:$0xff] %vm448_vm2, %v2756_v39  ;;  %v2757_v25 = vadd.f32 %v3571_v15, %v2663_v16  ;;  %v3585_v39 = vld [vmem:[%s3687_s28 + $0xd0] sm:$0xff] }
 0x7a5   : > { %2786 = vst.msk [vmem:[%s5211_s19 + $0x40] sm:$0xff] %vm448_vm2, %v2754_v27  ;;  %v2755_v20 = vadd.f32 %v3572_v44, %v2655_v40  ;;  %v3586_v27 = vld [vmem:[%s3687_s28 + $0xc0] sm:$0xff] }
 0x7a6   : > { %2789 = vst.msk [vmem:[%s5211_s19 + $0x58] sm:$0xff] %vm448_vm2, %v2757_v25  ;;  %v3587_v25 = vld [vmem:[%s3687_s28 + $0xd8] sm:$0xff] }
 0x7a7   : > { %2787 = vst.msk [vmem:[%s5211_s19 + $0x48] sm:$0xff] %vm448_vm2, %v2755_v20  ;;  %v3588_v20 = vld [vmem:[%s3687_s28 + $0xc8] sm:$0xff] }
 0x7af   : > { %v3327_v5 = vpop.f32.mrb[112].mxu1 }
 0x7b0   : > { %v2676_v4 = vadd.f32 %v3327_v5, %v5203_v63  ;;  %v2667_v61 = vpop.f32.mrb[113].mxu1 }
 0x7b1   : > { %v2668_v56 = vadd.f32 %v5203_v63, %v2667_v61  ;;  %v3328_v0 = vpop.f32.mrb[114].mxu1 }
 0x7b2   : > { %v2760_v30 = vadd.f32 %v3573_v59, %v2676_v4  ;;  %v2679_v41 = vadd.f32 %v3328_v0, %v5203_v63  ;;  %v2670_v45 = vpop.f32.mrb[115].mxu1 }
 0x7b3   : > { %v2758_v51 = vadd.f32 %v3574_v8, %v2668_v56  ;;  %v2671_v58 = vadd.f32 %v5203_v63, %v2670_v45 }
 0x7b4   : > { %2792 = vst.msk [vmem:[%s5211_s19 + $0x70] sm:$0xff] %vm448_vm2, %v2760_v30  ;;  %v2761_v9 = vadd.f32 %v3575_v50, %v2679_v41  ;;  %v3589_v30 = vld [vmem:[%s3687_s28 + $0xf0] sm:$0xff] }
 0x7b5   : > { %2790 = vst.msk [vmem:[%s5211_s19 + $0x60] sm:$0xff] %vm448_vm2, %v2758_v51  ;;  %v2759_v46 = vadd.f32 %v3576_v55, %v2671_v58  ;;  %v3590_v51 = vld [vmem:[%s3687_s28 + $0xe0] sm:$0xff] }
 0x7b6   : > { %2793 = vst.msk [vmem:[%s5211_s19 + $0x78] sm:$0xff] %vm448_vm2, %v2761_v9  ;;  %v3591_v9 = vld [vmem:[%s3687_s28 + $0xf8] sm:$0xff] }
 0x7b7   : > { %2791 = vst.msk [vmem:[%s5211_s19 + $0x68] sm:$0xff] %vm448_vm2, %v2759_v46  ;;  %v3592_v46 = vld [vmem:[%s3687_s28 + $0xe8] sm:$0xff] }
 0x7bf   : > { %v3331_v21 = vpop.f32.mrb[116].mxu1 }
 0x7c0   : > { %v2692_v38 = vadd.f32 %v3331_v21, %v5203_v63  ;;  %v2683_v37 = vpop.f32.mrb[117].mxu1 }
 0x7c1   : > { %v2684_v47 = vadd.f32 %v5203_v63, %v2683_v37  ;;  %v3332_v31 = vpop.f32.mrb[118].mxu1 }
 0x7c2   : > { %v2764_v24 = vadd.f32 %v3577_v32, %v2692_v38  ;;  %v2695_v1 = vadd.f32 %v3332_v31, %v5203_v63  ;;  %v2686_v49 = vpop.f32.mrb[119].mxu1 }
 0x7c3   : > { %v2762_v42 = vadd.f32 %v3578_v26, %v2684_v47  ;;  %v2687_v54 = vadd.f32 %v5203_v63, %v2686_v49 }
 0x7c4   : > { %2796 = vst.msk [vmem:[%s5211_s19 + $0x90] sm:$0xff] %vm448_vm2, %v2764_v24  ;;  %v2765_v60 = vadd.f32 %v3579_v48, %v2695_v1 }
 0x7c5   : > { %2794 = vst.msk [vmem:[%s5211_s19 + $0x80] sm:$0xff] %vm448_vm2, %v2762_v42  ;;  %v2763_v33 = vadd.f32 %v3580_v22, %v2687_v54 }
 0x7c6   : > { %2797 = vst.msk [vmem:[%s5211_s19 + $0x98] sm:$0xff] %vm448_vm2, %v2765_v60 }
 0x7c7   : > { %2795 = vst.msk [vmem:[%s5211_s19 + $0x88] sm:$0xff] %vm448_vm2, %v2763_v33 }
 0x7cf   : > { %v3335_v43 = vpop.f32.mrb[120].mxu1 }
 0x7d0   : > { %v2708_v57 = vadd.f32 %v3335_v43, %v5203_v63  ;;  %v2699_v3 = vpop.f32.mrb[121].mxu1 }
 0x7d1   : > { %v2700_v13 = vadd.f32 %v5203_v63, %v2699_v3  ;;  %v3336_v2 = vpop.f32.mrb[122].mxu1 }
 0x7d2   : > { %v2768_v23 = vadd.f32 %v3581_v6, %v2708_v57  ;;  %v2711_v29 = vadd.f32 %v3336_v2, %v5203_v63  ;;  %v2702_v28 = vpop.f32.mrb[123].mxu1 }
 0x7d3   : > { %v2766_v11 = vadd.f32 %v3582_v14, %v2700_v13  ;;  %v2703_v19 = vadd.f32 %v5203_v63, %v2702_v28 }
 0x7d4   : > { %2800 = vst.msk [vmem:[%s5211_s19 + $0xb0] sm:$0xff] %vm448_vm2, %v2768_v23  ;;  %v2769_v62 = vadd.f32 %v3583_v35, %v2711_v29 }
 0x7d5   : > { %2798 = vst.msk [vmem:[%s5211_s19 + $0xa0] sm:$0xff] %vm448_vm2, %v2766_v11  ;;  %v2767_v10 = vadd.f32 %v3584_v18, %v2703_v19 }
 0x7d6   : > { %2801 = vst.msk [vmem:[%s5211_s19 + $0xb8] sm:$0xff] %vm448_vm2, %v2769_v62 }
 0x7d7   : > { %2799 = vst.msk [vmem:[%s5211_s19 + $0xa8] sm:$0xff] %vm448_vm2, %v2767_v10 }
 0x821   : > { %v3339_v17 = vpop.f32.mrb[124].mxu1 }
 0x822   : > { %v2724_v52 = vadd.f32 %v3339_v17, %v5203_v63  ;;  %v2715_v12 = vpop.f32.mrb[125].mxu1 }
 0x823   : > { %v2716_v34 = vadd.f32 %v5203_v63, %v2715_v12  ;;  %v3340_v7 = vpop.f32.mrb[126].mxu1 }
 0x824   : > { %v2772_v16 = vadd.f32 %v3585_v39, %v2724_v52  ;;  %v2727_v36 = vadd.f32 %v3340_v7, %v5203_v63  ;;  %v2718_v53 = vpop.f32.mrb[127].mxu1 }
 0x825   : > { %v2770_v40 = vadd.f32 %v3586_v27, %v2716_v34  ;;  %v2719_v15 = vadd.f32 %v5203_v63, %v2718_v53 }
 0x826   : > { %2804 = vst.msk [vmem:[%s5211_s19 + $0xd0] sm:$0xff] %vm448_vm2, %v2772_v16  ;;  %v2773_v44 = vadd.f32 %v3587_v25, %v2727_v36 }
 0x827   : > { %2802 = vst.msk [vmem:[%s5211_s19 + $0xc0] sm:$0xff] %vm448_vm2, %v2770_v40  ;;  %v2771_v5 = vadd.f32 %v3588_v20, %v2719_v15 }
 0x828   : > { %2805 = vst.msk [vmem:[%s5211_s19 + $0xd8] sm:$0xff] %vm448_vm2, %v2773_v44 }
 0x829   : > { %2803 = vst.msk [vmem:[%s5211_s19 + $0xc8] sm:$0xff] %vm448_vm2, %v2771_v5 }
 0x831   : > { %v3343_v4 = vpop.f32.mrb[128].mxu1 }
 0x832   : > { %v2740_v61 = vadd.f32 %v3343_v4, %v5203_v63  ;;  %v2731_v56 = vpop.f32.mrb[129].mxu1 }
 0x833   : > { %v2732_v0 = vadd.f32 %v5203_v63, %v2731_v56  ;;  %v3344_v59 = vpop.f32.mrb[130].mxu1 }
 0x834   : > { %v2776_v41 = vadd.f32 %v3589_v30, %v2740_v61  ;;  %v2743_v45 = vadd.f32 %v3344_v59, %v5203_v63  ;;  %v2734_v8 = vpop.f32.mrb[131].mxu1 }
 0x835   : > { %v2774_v58 = vadd.f32 %v3590_v51, %v2732_v0  ;;  %v2735_v50 = vadd.f32 %v5203_v63, %v2734_v8 }
 0x836   : > { %2808 = vst.msk [vmem:[%s5211_s19 + $0xf0] sm:$0xff] %vm448_vm2, %v2776_v41  ;;  %v2777_v55 = vadd.f32 %v3591_v9, %v2743_v45 }
 0x837   : > { %2806 = vst.msk [vmem:[%s5211_s19 + $0xe0] sm:$0xff] %vm448_vm2, %v2774_v58  ;;  %v2775_v21 = vadd.f32 %v3592_v46, %v2735_v50 }
 0x838   : > { %2809 = vst.msk [vmem:[%s5211_s19 + $0xf8] sm:$0xff] %vm448_vm2, %v2777_v55 }
 0x839   : > { %2807 = vst.msk [vmem:[%s5211_s19 + $0xe8] sm:$0xff] %vm448_vm2, %v2775_v21 }
 0x83a PF: > { %s22_s21 = sadd.s32 1, %s3599_s21  }
 0x83b   : > { %p19_p4 = scmp.ge.s32.totalorder %s22_s21, 4  }
 0x83d   :  { %21 = sbr.rel (!%p19_p4) target bundleno = 1 (0x1), region = 98 }

</bundles_post_ra>
